<compile_context>
chip_gen: v7x
topology: tpu7x:2x2x1
jax: 0.10.0
libtpu: 0.0.40
codegen_flags: <defaults>
</compile_context>

<pallas_src>
import functools

import jax
import jax.numpy as jnp
from jax.experimental import pallas as pl
from jax.experimental.pallas import tpu as pltpu


def _pick_tile_rows(hu, wu, lane_budget=2048):
    """Largest multiple-of-8 divisor of hu with tile_rows*(wu+2) <= lane_budget."""
    best = None
    for d in range(8, hu + 1, 8):
        if hu % d == 0 and d * (wu + 2) <= lane_budget:
            best = d
    if best is None:
        return hu           # whole image as one tile (block == full dim is legal)
    if best == hu and hu % 16 == 0:
        best = hu // 2      # keep >=2 row tiles so the pipeline / accumulation runs
    return best


# -----------------------------------------------------------------------------
# Pass 1: fused 3x3 conv (9 shifted matmuls) + bias + masked GroupNorm partial
# statistics, accumulated across the row-tile grid axis.
# -----------------------------------------------------------------------------
def _conv_stats_kernel(x_ref, w_ref, b_ref, m_ref, y_ref, s_ref, q_ref,
                       *, wu, tile_rows, cout):
    # x_ref : (1, 1, Cin, Lp2)  upsampled+padded activation tile, channel-major,
    #                           flat (row-major) spatial on lanes
    # w_ref : (9, Cout, Cin)    conv taps (tap = 3*dy + dx)
    # b_ref : (Cout, 1)  f32    conv bias
    # m_ref : (1, L)     f32    valid-column mask (zeros on the 2 "wide" columns)
    # y_ref : (1, 1, Cout, L)   conv+bias output in "wide" flat layout (f32)
    # s_ref : (1, Cout, 1)      per-channel sum      (accumulated over row tiles)
    # q_ref : (1, Cout, 1)      per-channel sum-sq   (accumulated over row tiles)
    wrow = wu + 2
    L = tile_rows * wrow
    x = x_ref[0, 0]                                   # (Cin, Lp2)

    acc = None
    for dy in range(3):
        for dx in range(3):
            off = dy * wrow + dx
            xs = x[:, off:off + L]                    # static shifted window
            d = jnp.dot(w_ref[3 * dy + dx], xs,
                        preferred_element_type=jnp.float32)
            acc = d if acc is None else acc + d       # (Cout, L) f32

    y = acc + b_ref[...]                              # (Cout, L) + (Cout, 1)
    y_ref[0, 0] = y.astype(y_ref.dtype)

    @pl.when(pl.program_id(1) == 0)
    def _init():
        s_ref[...] = jnp.zeros_like(s_ref)
        q_ref[...] = jnp.zeros_like(q_ref)

    ym = y * m_ref[...]                               # mask out-of-row columns
    s_ref[0] += jnp.sum(ym, axis=1, keepdims=True)    # (Cout, 1)
    q_ref[0] += jnp.sum(ym * y, axis=1, keepdims=True)


# -----------------------------------------------------------------------------
# Pass 2: apply GroupNorm affine (per-sample/per-channel scale & shift) while
# narrowing the "wide" layout; the output BlockSpec writes NCHW directly.
# -----------------------------------------------------------------------------
def _norm_kernel(y_ref, sc_ref, sh_ref, o_ref, *, wu):
    # y_ref : (1, 1, Cout, TH, Wu+2)   wide conv output (free reshape of pass-1 out)
    # sc_ref: (1, Cout, TH, 1)         GroupNorm scale
    # sh_ref: (1, Cout, TH, 1)         GroupNorm shift
    # o_ref : (1, Cout, TH, Wu)        final NCHW output tile
    y = y_ref[0, 0]                                   # (Cout, TH, Wu+2)
    o_ref[0] = (y[:, :, :wu] * sc_ref[0] + sh_ref[0]).astype(o_ref.dtype)


@functools.partial(jax.jit,
                   static_argnames=("scale", "num_groups", "eps", "compute_dtype"))
def upsample_forward(x, weight, bias, gamma, beta, *, scale, num_groups,
                     eps=1e-5, compute_dtype=jnp.float32):
    """x: (N, Cin, H, W) f32 NCHW.  Returns (N, Cout, H*scale, W*scale) f32 NCHW."""
    N, Cin, H, W = x.shape
    Cout = weight.shape[0]
    assert Cout % num_groups == 0, "GroupNorm requires Cout % num_groups == 0"
    cg = Cout // num_groups
    Hu, Wu = H * scale, W * scale
    TH = _pick_tile_rows(Hu, Wu)
    nT = Hu // TH
    wrow = Wu + 2
    Lp = (TH + 2) * wrow
    Lp2 = Lp + 2            # +2 so every static tap window stays in range
    L = TH * wrow

    # ---- glue: nearest upsample + pad + overlapped row tiles (channel-major) ----
    # TODO(synk): fuse the nearest-upsample + halo tiling into the Pallas kernel
    # via manual DMA of the raw NCHW input to avoid this scale^2-sized HBM
    # intermediate (the 9x im2col expansion is already gone).
    x_up = jnp.repeat(jnp.repeat(x, scale, axis=2), scale, axis=3)     # (N,Cin,Hu,Wu)
    x_pad = jnp.pad(x_up, ((0, 0), (0, 0), (1, 1), (1, 1)))            # (N,Cin,Hu+2,Wu+2)
    row_idx = jnp.arange(nT)[:, None] * TH + jnp.arange(TH + 2)[None, :]
    x_tiles = x_pad[:, :, row_idx, :]                                  # (N,Cin,nT,TH+2,Wu+2)
    x_tiles = jnp.transpose(x_tiles, (0, 2, 1, 3, 4)).reshape(N, nT, Cin, Lp)
    x_tiles = jnp.pad(x_tiles, ((0, 0), (0, 0), (0, 0), (0, 2)))
    x_tiles = x_tiles.astype(compute_dtype)                            # (N,nT,Cin,Lp2)

    # conv weight (Cout, Cin, 3, 3) -> (9, Cout, Cin), tap index = 3*dy + dx
    w_taps = jnp.transpose(weight, (2, 3, 0, 1)).reshape(9, Cout, Cin)
    w_taps = w_taps.astype(compute_dtype)
    b_col = bias.reshape(Cout, 1).astype(jnp.float32)
    col = jnp.arange(L, dtype=jnp.int32) % wrow
    mask = (col < Wu).astype(jnp.float32).reshape(1, L)

    itemsize = jnp.dtype(compute_dtype).itemsize
    cost = pl.CostEstimate(
        flops=2 * 9 * N * nT * L * Cin * Cout,
        transcendentals=0,
        bytes_accessed=int(N * nT * Cin * Lp2 * itemsize
                           + 9 * Cout * Cin * itemsize
                           + N * nT * Cout * L * 4
                           + 2 * N * Cout * 4))

    # ---- pass 1: conv + bias + partial GroupNorm statistics ---------------------
    y_wide, ysum, ysq = pl.pallas_call(
        functools.partial(_conv_stats_kernel, wu=Wu, tile_rows=TH, cout=Cout),
        grid=(N, nT),
        in_specs=[
            pl.BlockSpec((1, 1, Cin, Lp2), lambda n, t: (n, t, 0, 0)),
            pl.BlockSpec((9, Cout, Cin), lambda n, t: (0, 0, 0)),
            pl.BlockSpec((Cout, 1), lambda n, t: (0, 0)),
            pl.BlockSpec((1, L), lambda n, t: (0, 0)),
        ],
        out_specs=(
            pl.BlockSpec((1, 1, Cout, L), lambda n, t: (n, t, 0, 0)),
            pl.BlockSpec((1, Cout, 1), lambda n, t: (n, 0, 0)),
            pl.BlockSpec((1, Cout, 1), lambda n, t: (n, 0, 0)),
        ),
        out_shape=(
            jax.ShapeDtypeStruct((N, nT, Cout, L), jnp.float32),
            jax.ShapeDtypeStruct((N, Cout, 1), jnp.float32),
            jax.ShapeDtypeStruct((N, Cout, 1), jnp.float32),
        ),
        compiler_params=pltpu.CompilerParams(
            dimension_semantics=("parallel", "arbitrary"),
            vmem_limit_bytes=64 * 1024 * 1024),
        cost_estimate=cost,
    )(x_tiles, w_taps, b_col, mask)

    # ---- tiny wrapper reduction: per-group stats -> per-channel scale/shift -----
    s = ysum[:, :, 0]                                  # (N, Cout)
    q = ysq[:, :, 0]
    cnt = jnp.float32(cg * Hu * Wu)
    mean_g = s.reshape(N, num_groups, cg).sum(axis=2) / cnt
    ex2_g = q.reshape(N, num_groups, cg).sum(axis=2) / cnt
    # NOTE: E[y^2] - E[y]^2 in f32 (clamped); fine for GN-scale activations.
    var_g = jnp.maximum(ex2_g - mean_g * mean_g, 0.0)
    inv_g = jax.lax.rsqrt(var_g + eps)
    inv_c = jnp.repeat(inv_g, cg, axis=1)              # (N, Cout)
    mean_c = jnp.repeat(mean_g, cg, axis=1)
    scale_c = gamma[None, :] * inv_c
    shift_c = beta[None, :] - mean_c * scale_c
    scale_t = jnp.broadcast_to(scale_c[:, :, None, None], (N, Cout, TH, 1))
    shift_t = jnp.broadcast_to(shift_c[:, :, None, None], (N, Cout, TH, 1))

    # ---- pass 2: normalize + narrow; output BlockSpec writes NCHW directly ------
    y5 = y_wide.reshape(N, nT, Cout, TH, wrow)         # free (order-preserving) view
    out = pl.pallas_call(
        functools.partial(_norm_kernel, wu=Wu),
        grid=(N, nT),
        in_specs=[
            pl.BlockSpec((1, 1, Cout, TH, wrow), lambda n, t: (n, t, 0, 0, 0)),
            pl.BlockSpec((1, Cout, TH, 1), lambda n, t: (n, 0, 0, 0)),
            pl.BlockSpec((1, Cout, TH, 1), lambda n, t: (n, 0, 0, 0)),
        ],
        out_specs=pl.BlockSpec((1, Cout, TH, Wu), lambda n, t: (n, 0, t, 0)),
        out_shape=jax.ShapeDtypeStruct((N, Cout, Hu, Wu), jnp.float32),
        compiler_params=pltpu.CompilerParams(
            dimension_semantics=("parallel", "parallel"),
            vmem_limit_bytes=64 * 1024 * 1024),
    )(y5, scale_t, shift_t)
    return out


# -----------------------------------------------------------------------------
# Pure-JAX reference (matches the PyTorch module semantics) for validation.
# -----------------------------------------------------------------------------
def upsample_reference(x, weight, bias, gamma, beta, *, scale, num_groups,
                       eps=1e-5):
    x_up = jnp.repeat(jnp.repeat(x, scale, axis=2), scale, axis=3)
    y = jax.lax.conv_general_dilated(
        x_up, weight, window_strides=(1, 1), padding=((1, 1), (1, 1)),
        dimension_numbers=("NCHW", "OIHW", "NCHW"))
    y = y + bias[None, :, None, None]
    N, C, H, W = y.shape
    yg = y.reshape(N, num_groups, C // num_groups, H, W)
    mean = jnp.mean(yg, axis=(2, 3, 4), keepdims=True)
    var = jnp.mean((yg - mean) ** 2, axis=(2, 3, 4), keepdims=True)
    yn = ((yg - mean) / jnp.sqrt(var + eps)).reshape(N, C, H, W)
    return yn * gamma[None, :, None, None] + beta[None, :, None, None]


if __name__ == "__main__":
    # Module config: UpSample(dim=4, dim_out=8, scale=2)
    dim, dim_out, scale = 4, 8, 2
    num_groups = max(1, dim_out // 4)

    key = jax.random.PRNGKey(0)
    kx, kw, kb, kg, kbt = jax.random.split(key, 5)

    x = jax.random.normal(kx, (2, dim, 16, 16), dtype=jnp.float32)       # NCHW
    weight = jax.random.normal(kw, (dim_out, dim, 3, 3), dtype=jnp.float32) * 0.1
    bias = jax.random.normal(kb, (dim_out,), dtype=jnp.float32) * 0.05
    gamma = 1.0 + 0.1 * jax.random.normal(kg, (dim_out,), dtype=jnp.float32)
    beta = 0.1 * jax.random.normal(kbt, (dim_out,), dtype=jnp.float32)

    ref = upsample_reference(x, weight, bias, gamma, beta,
                             scale=scale, num_groups=num_groups)
    ref = jax.block_until_ready(ref)

    # f32 compute path (bit-accurate vs. the f32 reference)
    out = upsample_forward(x, weight, bias, gamma, beta,
                           scale=scale, num_groups=num_groups,
                           compute_dtype=jnp.float32)
    out = jax.block_until_ready(out)
    assert out.shape == (2, dim_out, 16 * scale, 16 * scale), out.shape
    assert jnp.allclose(out, ref, atol=1e-4, rtol=1e-4), (
        float(jnp.max(jnp.abs(out - ref))))

    # bf16 MXU operands (f32 accumulation) -- looser tolerance
    out_bf16 = upsample_forward(x, weight, bias, gamma, beta,
                                scale=scale, num_groups=num_groups,
                                compute_dtype=jnp.bfloat16)
    out_bf16 = jax.block_until_ready(out_bf16)
    assert jnp.allclose(out_bf16, ref, atol=5e-2, rtol=5e-2), (
        float(jnp.max(jnp.abs(out_bf16 - ref))))

    print("KERNEL_OK")
</pallas_src>

<mosaic_0001>
module attributes {stable_mosaic.version = 11 : i64} {
  func.func @_conv_stats_kernel(%arg0: i32, %arg1: i32, %arg2: memref<1x1x4x614xf32, #tpu.memory_space<vmem>>, %arg3: memref<9x8x4xf32, #tpu.memory_space<vmem>>, %arg4: memref<8x1xf32, #tpu.memory_space<vmem>>, %arg5: memref<1x544xf32, #tpu.memory_space<vmem>>, %arg6: memref<1x1x8x544xf32, #tpu.memory_space<vmem>>, %arg7: memref<1x8x1xf32, #tpu.memory_space<vmem>>, %arg8: memref<1x8x1xf32, #tpu.memory_space<vmem>>) attributes {dimension_semantics = [#tpu.dimension_semantics<parallel>, #tpu.dimension_semantics<arbitrary>], iteration_bounds = array<i64: 2, 2>, scalar_prefetch = 0 : i64, scratch_operands = 0 : i64, tpu.core_type = #tpu.core_type<tc>, window_params = [{transform_indices = @transform_0, window_bounds = array<i64: 1, 1, 4, 614>}, {pipeline_mode = #tpu.pipeline_mode<synchronous>, transform_indices = @transform_1, window_bounds = array<i64: 9, 8, 4>}, {pipeline_mode = #tpu.pipeline_mode<synchronous>, transform_indices = @transform_2, window_bounds = array<i64: 8, 1>}, {pipeline_mode = #tpu.pipeline_mode<synchronous>, transform_indices = @transform_3, window_bounds = array<i64: 1, 544>}, {transform_indices = @transform_4, window_bounds = array<i64: 1, 1, 8, 544>}, {transform_indices = @transform_5, window_bounds = array<i64: 1, 8, 1>}, {transform_indices = @transform_6, window_bounds = array<i64: 1, 8, 1>}]} {
    %c0 = arith.constant 0 : index
    %c0_0 = arith.constant 0 : index
    %c0_1 = arith.constant 0 : index
    %c0_2 = arith.constant 0 : index
    %0 = vector.load %arg2[%c0, %c0_0, %c0_1, %c0_2] : memref<1x1x4x614xf32, #tpu.memory_space<vmem>>, vector<1x1x4x614xf32>
    %1 = vector.shape_cast %0 : vector<1x1x4x614xf32> to vector<4x614xf32>
    %2 = vector.extract_strided_slice %1 {offsets = [0, 0], sizes = [4, 544], strides = [1, 1]} : vector<4x614xf32> to vector<4x544xf32>
    %c0_3 = arith.constant 0 : index
    %c0_4 = arith.constant 0 : index
    %c0_5 = arith.constant 0 : index
    %3 = vector.load %arg3[%c0_3, %c0_4, %c0_5] : memref<9x8x4xf32, #tpu.memory_space<vmem>>, vector<1x8x4xf32>
    %4 = vector.shape_cast %3 : vector<1x8x4xf32> to vector<8x4xf32>
    %cst = arith.constant dense<0.000000e+00> : vector<8x544xf32>
    %5 = tpu.matmul %4, %2, %cst {dimension_numbers = #tpu.dot_dimension_numbers<[1], [0], [0], [1], [0, 0, 1, 1], [], []>} : vector<8x4xf32>, vector<4x544xf32>, vector<8x544xf32> -> vector<8x544xf32>
    %6 = vector.extract_strided_slice %1 {offsets = [0, 1], sizes = [4, 544], strides = [1, 1]} : vector<4x614xf32> to vector<4x544xf32>
    %c1 = arith.constant 1 : index
    %c0_6 = arith.constant 0 : index
    %c0_7 = arith.constant 0 : index
    %7 = vector.load %arg3[%c1, %c0_6, %c0_7] : memref<9x8x4xf32, #tpu.memory_space<vmem>>, vector<1x8x4xf32>
    %8 = vector.shape_cast %7 : vector<1x8x4xf32> to vector<8x4xf32>
    %cst_8 = arith.constant dense<0.000000e+00> : vector<8x544xf32>
    %9 = tpu.matmul %8, %6, %cst_8 {dimension_numbers = #tpu.dot_dimension_numbers<[1], [0], [0], [1], [0, 0, 1, 1], [], []>} : vector<8x4xf32>, vector<4x544xf32>, vector<8x544xf32> -> vector<8x544xf32>
    %10 = arith.addf %5, %9 : vector<8x544xf32>
    %11 = vector.extract_strided_slice %1 {offsets = [0, 2], sizes = [4, 544], strides = [1, 1]} : vector<4x614xf32> to vector<4x544xf32>
    %c2 = arith.constant 2 : index
    %c0_9 = arith.constant 0 : index
    %c0_10 = arith.constant 0 : index
    %12 = vector.load %arg3[%c2, %c0_9, %c0_10] : memref<9x8x4xf32, #tpu.memory_space<vmem>>, vector<1x8x4xf32>
    %13 = vector.shape_cast %12 : vector<1x8x4xf32> to vector<8x4xf32>
    %cst_11 = arith.constant dense<0.000000e+00> : vector<8x544xf32>
    %14 = tpu.matmul %13, %11, %cst_11 {dimension_numbers = #tpu.dot_dimension_numbers<[1], [0], [0], [1], [0, 0, 1, 1], [], []>} : vector<8x4xf32>, vector<4x544xf32>, vector<8x544xf32> -> vector<8x544xf32>
    %15 = arith.addf %10, %14 : vector<8x544xf32>
    %16 = vector.extract_strided_slice %1 {offsets = [0, 34], sizes = [4, 544], strides = [1, 1]} : vector<4x614xf32> to vector<4x544xf32>
    %c3 = arith.constant 3 : index
    %c0_12 = arith.constant 0 : index
    %c0_13 = arith.constant 0 : index
    %17 = vector.load %arg3[%c3, %c0_12, %c0_13] : memref<9x8x4xf32, #tpu.memory_space<vmem>>, vector<1x8x4xf32>
    %18 = vector.shape_cast %17 : vector<1x8x4xf32> to vector<8x4xf32>
    %cst_14 = arith.constant dense<0.000000e+00> : vector<8x544xf32>
    %19 = tpu.matmul %18, %16, %cst_14 {dimension_numbers = #tpu.dot_dimension_numbers<[1], [0], [0], [1], [0, 0, 1, 1], [], []>} : vector<8x4xf32>, vector<4x544xf32>, vector<8x544xf32> -> vector<8x544xf32>
    %20 = arith.addf %15, %19 : vector<8x544xf32>
    %21 = vector.extract_strided_slice %1 {offsets = [0, 35], sizes = [4, 544], strides = [1, 1]} : vector<4x614xf32> to vector<4x544xf32>
    %c4 = arith.constant 4 : index
    %c0_15 = arith.constant 0 : index
    %c0_16 = arith.constant 0 : index
    %22 = vector.load %arg3[%c4, %c0_15, %c0_16] : memref<9x8x4xf32, #tpu.memory_space<vmem>>, vector<1x8x4xf32>
    %23 = vector.shape_cast %22 : vector<1x8x4xf32> to vector<8x4xf32>
    %cst_17 = arith.constant dense<0.000000e+00> : vector<8x544xf32>
    %24 = tpu.matmul %23, %21, %cst_17 {dimension_numbers = #tpu.dot_dimension_numbers<[1], [0], [0], [1], [0, 0, 1, 1], [], []>} : vector<8x4xf32>, vector<4x544xf32>, vector<8x544xf32> -> vector<8x544xf32>
    %25 = arith.addf %20, %24 : vector<8x544xf32>
    %26 = vector.extract_strided_slice %1 {offsets = [0, 36], sizes = [4, 544], strides = [1, 1]} : vector<4x614xf32> to vector<4x544xf32>
    %c5 = arith.constant 5 : index
    %c0_18 = arith.constant 0 : index
    %c0_19 = arith.constant 0 : index
    %27 = vector.load %arg3[%c5, %c0_18, %c0_19] : memref<9x8x4xf32, #tpu.memory_space<vmem>>, vector<1x8x4xf32>
    %28 = vector.shape_cast %27 : vector<1x8x4xf32> to vector<8x4xf32>
    %cst_20 = arith.constant dense<0.000000e+00> : vector<8x544xf32>
    %29 = tpu.matmul %28, %26, %cst_20 {dimension_numbers = #tpu.dot_dimension_numbers<[1], [0], [0], [1], [0, 0, 1, 1], [], []>} : vector<8x4xf32>, vector<4x544xf32>, vector<8x544xf32> -> vector<8x544xf32>
    %30 = arith.addf %25, %29 : vector<8x544xf32>
    %31 = vector.extract_strided_slice %1 {offsets = [0, 68], sizes = [4, 544], strides = [1, 1]} : vector<4x614xf32> to vector<4x544xf32>
    %c6 = arith.constant 6 : index
    %c0_21 = arith.constant 0 : index
    %c0_22 = arith.constant 0 : index
    %32 = vector.load %arg3[%c6, %c0_21, %c0_22] : memref<9x8x4xf32, #tpu.memory_space<vmem>>, vector<1x8x4xf32>
    %33 = vector.shape_cast %32 : vector<1x8x4xf32> to vector<8x4xf32>
    %cst_23 = arith.constant dense<0.000000e+00> : vector<8x544xf32>
    %34 = tpu.matmul %33, %31, %cst_23 {dimension_numbers = #tpu.dot_dimension_numbers<[1], [0], [0], [1], [0, 0, 1, 1], [], []>} : vector<8x4xf32>, vector<4x544xf32>, vector<8x544xf32> -> vector<8x544xf32>
    %35 = arith.addf %30, %34 : vector<8x544xf32>
    %36 = vector.extract_strided_slice %1 {offsets = [0, 69], sizes = [4, 544], strides = [1, 1]} : vector<4x614xf32> to vector<4x544xf32>
    %c7 = arith.constant 7 : index
    %c0_24 = arith.constant 0 : index
    %c0_25 = arith.constant 0 : index
    %37 = vector.load %arg3[%c7, %c0_24, %c0_25] : memref<9x8x4xf32, #tpu.memory_space<vmem>>, vector<1x8x4xf32>
    %38 = vector.shape_cast %37 : vector<1x8x4xf32> to vector<8x4xf32>
    %cst_26 = arith.constant dense<0.000000e+00> : vector<8x544xf32>
    %39 = tpu.matmul %38, %36, %cst_26 {dimension_numbers = #tpu.dot_dimension_numbers<[1], [0], [0], [1], [0, 0, 1, 1], [], []>} : vector<8x4xf32>, vector<4x544xf32>, vector<8x544xf32> -> vector<8x544xf32>
    %40 = arith.addf %35, %39 : vector<8x544xf32>
    %41 = vector.extract_strided_slice %1 {offsets = [0, 70], sizes = [4, 544], strides = [1, 1]} : vector<4x614xf32> to vector<4x544xf32>
    %c8 = arith.constant 8 : index
    %c0_27 = arith.constant 0 : index
    %c0_28 = arith.constant 0 : index
    %42 = vector.load %arg3[%c8, %c0_27, %c0_28] : memref<9x8x4xf32, #tpu.memory_space<vmem>>, vector<1x8x4xf32>
    %43 = vector.shape_cast %42 : vector<1x8x4xf32> to vector<8x4xf32>
    %cst_29 = arith.constant dense<0.000000e+00> : vector<8x544xf32>
    %44 = tpu.matmul %43, %41, %cst_29 {dimension_numbers = #tpu.dot_dimension_numbers<[1], [0], [0], [1], [0, 0, 1, 1], [], []>} : vector<8x4xf32>, vector<4x544xf32>, vector<8x544xf32> -> vector<8x544xf32>
    %45 = arith.addf %40, %44 : vector<8x544xf32>
    %c0_30 = arith.constant 0 : index
    %c0_31 = arith.constant 0 : index
    %46 = vector.load %arg4[%c0_30, %c0_31] : memref<8x1xf32, #tpu.memory_space<vmem>>, vector<8x1xf32>
    %47 = vector.broadcast %46 : vector<8x1xf32> to vector<8x544xf32>
    %48 = arith.addf %45, %47 : vector<8x544xf32>
    %c0_32 = arith.constant 0 : index
    %c0_33 = arith.constant 0 : index
    %c0_34 = arith.constant 0 : index
    %c0_35 = arith.constant 0 : index
    %49 = vector.load %arg6[%c0_32, %c0_33, %c0_34, %c0_35] : memref<1x1x8x544xf32, #tpu.memory_space<vmem>>, vector<1x1x8x544xf32>
    %50 = vector.shape_cast %49 : vector<1x1x8x544xf32> to vector<8x544xf32>
    %51 = vector.shape_cast %48 : vector<8x544xf32> to vector<1x1x8x544xf32>
    tpu.vector_store %arg6[%c0_32, %c0_33, %c0_34, %c0_35], %51 {strides = array<i32>} : memref<1x1x8x544xf32, #tpu.memory_space<vmem>>, vector<1x1x8x544xf32>,
    %c0_i32 = arith.constant 0 : i32
    %52 = arith.cmpi eq, %arg1, %c0_i32 : i32
    %53 = arith.extui %52 : i1 to i32
    %c0_i32_36 = arith.constant 0 : i32
    %54 = arith.cmpi ne, %53, %c0_i32_36 : i32
    scf.if %54 {
      %cst_53 = arith.constant 0.000000e+00 : f32
      %75 = vector.broadcast %cst_53 : f32 to vector<1x8x1xf32>
      %c0_54 = arith.constant 0 : index
      %c0_55 = arith.constant 0 : index
      %c0_56 = arith.constant 0 : index
      %76 = vector.load %arg7[%c0_54, %c0_55, %c0_56] : memref<1x8x1xf32, #tpu.memory_space<vmem>>, vector<1x8x1xf32>
      tpu.vector_store %arg7[%c0_54, %c0_55, %c0_56], %75 {strides = array<i32>} : memref<1x8x1xf32, #tpu.memory_space<vmem>>, vector<1x8x1xf32>,
      %cst_57 = arith.constant 0.000000e+00 : f32
      %77 = vector.broadcast %cst_57 : f32 to vector<1x8x1xf32>
      %c0_58 = arith.constant 0 : index
      %c0_59 = arith.constant 0 : index
      %c0_60 = arith.constant 0 : index
      %78 = vector.load %arg8[%c0_58, %c0_59, %c0_60] : memref<1x8x1xf32, #tpu.memory_space<vmem>>, vector<1x8x1xf32>
      tpu.vector_store %arg8[%c0_58, %c0_59, %c0_60], %77 {strides = array<i32>} : memref<1x8x1xf32, #tpu.memory_space<vmem>>, vector<1x8x1xf32>,
    } else {
    }
    %c0_37 = arith.constant 0 : index
    %c0_38 = arith.constant 0 : index
    %55 = vector.load %arg5[%c0_37, %c0_38] : memref<1x544xf32, #tpu.memory_space<vmem>>, vector<1x544xf32>
    %56 = vector.broadcast %55 : vector<1x544xf32> to vector<8x544xf32>
    %57 = arith.mulf %48, %56 : vector<8x544xf32>
    %c0_39 = arith.constant 0 : index
    %c0_40 = arith.constant 0 : index
    %c0_41 = arith.constant 0 : index
    %58 = vector.load %arg7[%c0_39, %c0_40, %c0_41] : memref<1x8x1xf32, #tpu.memory_space<vmem>>, vector<1x8x1xf32>
    %59 = vector.shape_cast %58 : vector<1x8x1xf32> to vector<8x1xf32>
    %cst_42 = arith.constant dense<0.000000e+00> : vector<8xf32>
    %60 = vector.multi_reduction <add>, %57, %cst_42 [1] : vector<8x544xf32> to vector<8xf32>
    %61 = vector.shape_cast %60 : vector<8xf32> to vector<8x1xf32>
    %62 = arith.addf %59, %61 : vector<8x1xf32>
    %c0_43 = arith.constant 0 : index
    %c0_44 = arith.constant 0 : index
    %c0_45 = arith.constant 0 : index
    %63 = vector.load %arg7[%c0_43, %c0_44, %c0_45] : memref<1x8x1xf32, #tpu.memory_space<vmem>>, vector<1x8x1xf32>
    %64 = vector.shape_cast %63 : vector<1x8x1xf32> to vector<8x1xf32>
    %65 = vector.shape_cast %62 : vector<8x1xf32> to vector<1x8x1xf32>
    tpu.vector_store %arg7[%c0_43, %c0_44, %c0_45], %65 {strides = array<i32>} : memref<1x8x1xf32, #tpu.memory_space<vmem>>, vector<1x8x1xf32>,
    %c0_46 = arith.constant 0 : index
    %c0_47 = arith.constant 0 : index
    %c0_48 = arith.constant 0 : index
    %66 = vector.load %arg8[%c0_46, %c0_47, %c0_48] : memref<1x8x1xf32, #tpu.memory_space<vmem>>, vector<1x8x1xf32>
    %67 = vector.shape_cast %66 : vector<1x8x1xf32> to vector<8x1xf32>
    %68 = arith.mulf %57, %48 : vector<8x544xf32>
    %cst_49 = arith.constant dense<0.000000e+00> : vector<8xf32>
    %69 = vector.multi_reduction <add>, %68, %cst_49 [1] : vector<8x544xf32> to vector<8xf32>
    %70 = vector.shape_cast %69 : vector<8xf32> to vector<8x1xf32>
    %71 = arith.addf %67, %70 : vector<8x1xf32>
    %c0_50 = arith.constant 0 : index
    %c0_51 = arith.constant 0 : index
    %c0_52 = arith.constant 0 : index
    %72 = vector.load %arg8[%c0_50, %c0_51, %c0_52] : memref<1x8x1xf32, #tpu.memory_space<vmem>>, vector<1x8x1xf32>
    %73 = vector.shape_cast %72 : vector<1x8x1xf32> to vector<8x1xf32>
    %74 = vector.shape_cast %71 : vector<8x1xf32> to vector<1x8x1xf32>
    tpu.vector_store %arg8[%c0_50, %c0_51, %c0_52], %74 {strides = array<i32>} : memref<1x8x1xf32, #tpu.memory_space<vmem>>, vector<1x8x1xf32>,
    return
  }
  func.func @transform_0(%arg0: i32, %arg1: i32) -> (i32, i32, i32, i32) {
    %c0_i32 = arith.constant 0 : i32
    %c0_i32_0 = arith.constant 0 : i32
    %c0_i32_1 = arith.constant 0 : i32
    return %arg0, %arg1, %c0_i32, %c0_i32_0 : i32, i32, i32, i32
  }
  func.func @transform_1(%arg0: i32, %arg1: i32) -> (i32, i32, i32) {
    %c0_i32 = arith.constant 0 : i32
    %c0_i32_0 = arith.constant 0 : i32
    %c0_i32_1 = arith.constant 0 : i32
    %c0_i32_2 = arith.constant 0 : i32
    return %c0_i32, %c0_i32_0, %c0_i32_1 : i32, i32, i32
  }
  func.func @transform_2(%arg0: i32, %arg1: i32) -> (i32, i32) {
    %c0_i32 = arith.constant 0 : i32
    %c0_i32_0 = arith.constant 0 : i32
    %c0_i32_1 = arith.constant 0 : i32
    return %c0_i32, %c0_i32_0 : i32, i32
  }
  func.func @transform_3(%arg0: i32, %arg1: i32) -> (i32, i32) {
    %c0_i32 = arith.constant 0 : i32
    %c0_i32_0 = arith.constant 0 : i32
    %c0_i32_1 = arith.constant 0 : i32
    return %c0_i32, %c0_i32_0 : i32, i32
  }
  func.func @transform_4(%arg0: i32, %arg1: i32) -> (i32, i32, i32, i32) {
    %c0_i32 = arith.constant 0 : i32
    %c0_i32_0 = arith.constant 0 : i32
    %c0_i32_1 = arith.constant 0 : i32
    return %arg0, %arg1, %c0_i32, %c0_i32_0 : i32, i32, i32, i32
  }
  func.func @transform_5(%arg0: i32, %arg1: i32) -> (i32, i32, i32) {
    %c0_i32 = arith.constant 0 : i32
    %c0_i32_0 = arith.constant 0 : i32
    %c0_i32_1 = arith.constant 0 : i32
    return %arg0, %c0_i32, %c0_i32_0 : i32, i32, i32
  }
  func.func @transform_6(%arg0: i32, %arg1: i32) -> (i32, i32, i32) {
    %c0_i32 = arith.constant 0 : i32
    %c0_i32_0 = arith.constant 0 : i32
    %c0_i32_1 = arith.constant 0 : i32
    return %arg0, %c0_i32, %c0_i32_0 : i32, i32, i32
  }
}

module attributes {stable_mosaic.version = 11 : i64} {
  func.func @_norm_kernel(%arg0: i32, %arg1: i32, %arg2: memref<1x1x8x16x34xf32, #tpu.memory_space<vmem>>, %arg3: memref<1x8x16x1xf32, #tpu.memory_space<vmem>>, %arg4: memref<1x8x16x1xf32, #tpu.memory_space<vmem>>, %arg5: memref<1x8x16x32xf32, #tpu.memory_space<vmem>>) attributes {dimension_semantics = [#tpu.dimension_semantics<parallel>, #tpu.dimension_semantics<parallel>], iteration_bounds = array<i64: 2, 2>, scalar_prefetch = 0 : i64, scratch_operands = 0 : i64, tpu.core_type = #tpu.core_type<tc>, window_params = [{transform_indices = @transform_0, window_bounds = array<i64: 1, 1, 8, 16, 34>}, {transform_indices = @transform_1, window_bounds = array<i64: 1, 8, 16, 1>}, {transform_indices = @transform_2, window_bounds = array<i64: 1, 8, 16, 1>}, {transform_indices = @transform_3, window_bounds = array<i64: 1, 8, 16, 32>}]} {
    %c0 = arith.constant 0 : index
    %c0_0 = arith.constant 0 : index
    %c0_1 = arith.constant 0 : index
    %c0_2 = arith.constant 0 : index
    %c0_3 = arith.constant 0 : index
    %0 = vector.load %arg2[%c0, %c0_0, %c0_1, %c0_2, %c0_3] : memref<1x1x8x16x34xf32, #tpu.memory_space<vmem>>, vector<1x1x8x16x34xf32>
    %1 = vector.shape_cast %0 : vector<1x1x8x16x34xf32> to vector<8x16x34xf32>
    %2 = vector.extract_strided_slice %1 {offsets = [0, 0, 0], sizes = [8, 16, 32], strides = [1, 1, 1]} : vector<8x16x34xf32> to vector<8x16x32xf32>
    %c0_4 = arith.constant 0 : index
    %c0_5 = arith.constant 0 : index
    %c0_6 = arith.constant 0 : index
    %c0_7 = arith.constant 0 : index
    %3 = vector.load %arg3[%c0_4, %c0_5, %c0_6, %c0_7] : memref<1x8x16x1xf32, #tpu.memory_space<vmem>>, vector<1x8x16x1xf32>
    %4 = vector.shape_cast %3 : vector<1x8x16x1xf32> to vector<8x16x1xf32>
    %5 = vector.broadcast %4 : vector<8x16x1xf32> to vector<8x16x32xf32>
    %6 = arith.mulf %2, %5 : vector<8x16x32xf32>
    %c0_8 = arith.constant 0 : index
    %c0_9 = arith.constant 0 : index
    %c0_10 = arith.constant 0 : index
    %c0_11 = arith.constant 0 : index
    %7 = vector.load %arg4[%c0_8, %c0_9, %c0_10, %c0_11] : memref<1x8x16x1xf32, #tpu.memory_space<vmem>>, vector<1x8x16x1xf32>
    %8 = vector.shape_cast %7 : vector<1x8x16x1xf32> to vector<8x16x1xf32>
    %9 = vector.broadcast %8 : vector<8x16x1xf32> to vector<8x16x32xf32>
    %10 = arith.addf %6, %9 : vector<8x16x32xf32>
    %c0_12 = arith.constant 0 : index
    %c0_13 = arith.constant 0 : index
    %c0_14 = arith.constant 0 : index
    %c0_15 = arith.constant 0 : index
    %11 = vector.load %arg5[%c0_12, %c0_13, %c0_14, %c0_15] : memref<1x8x16x32xf32, #tpu.memory_space<vmem>>, vector<1x8x16x32xf32>
    %12 = vector.shape_cast %11 : vector<1x8x16x32xf32> to vector<8x16x32xf32>
    %13 = vector.shape_cast %10 : vector<8x16x32xf32> to vector<1x8x16x32xf32>
    tpu.vector_store %arg5[%c0_12, %c0_13, %c0_14, %c0_15], %13 {strides = array<i32>} : memref<1x8x16x32xf32, #tpu.memory_space<vmem>>, vector<1x8x16x32xf32>,
    return
  }
  func.func @transform_0(%arg0: i32, %arg1: i32) -> (i32, i32, i32, i32, i32) {
    %c0_i32 = arith.constant 0 : i32
    %c0_i32_0 = arith.constant 0 : i32
    %c0_i32_1 = arith.constant 0 : i32
    %c0_i32_2 = arith.constant 0 : i32
    return %arg0, %arg1, %c0_i32, %c0_i32_0, %c0_i32_1 : i32, i32, i32, i32, i32
  }
  func.func @transform_1(%arg0: i32, %arg1: i32) -> (i32, i32, i32, i32) {
    %c0_i32 = arith.constant 0 : i32
    %c0_i32_0 = arith.constant 0 : i32
    %c0_i32_1 = arith.constant 0 : i32
    %c0_i32_2 = arith.constant 0 : i32
    return %arg0, %c0_i32, %c0_i32_0, %c0_i32_1 : i32, i32, i32, i32
  }
  func.func @transform_2(%arg0: i32, %arg1: i32) -> (i32, i32, i32, i32) {
    %c0_i32 = arith.constant 0 : i32
    %c0_i32_0 = arith.constant 0 : i32
    %c0_i32_1 = arith.constant 0 : i32
    %c0_i32_2 = arith.constant 0 : i32
    return %arg0, %c0_i32, %c0_i32_0, %c0_i32_1 : i32, i32, i32, i32
  }
  func.func @transform_3(%arg0: i32, %arg1: i32) -> (i32, i32, i32, i32) {
    %c0_i32 = arith.constant 0 : i32
    %c0_i32_0 = arith.constant 0 : i32
    %c0_i32_1 = arith.constant 0 : i32
    return %arg0, %c0_i32, %arg1, %c0_i32_0 : i32, i32, i32, i32
  }
}

</mosaic_0001>

<bundles_post_ra>
// kernel: squeeze.2
= control target key start
LH: loop header
LB: loop body
LE: loop exit
PB: predicated region body
PF: predicated region fallthrough
CT: control target
= control target key end

     0   :  { %vm7_vm0 = vcmask 31744   ;;  %s48_s0 = inlined_call_operand.vmem [shape: f32[2,8], index: 0, kind: input, shape index: {}]   ;;  %s49_s1 = inlined_call_operand.vmem [shape: f32[2,2,4], index: 1, kind: output, shape index: {}]  }
   0x1   :  { %v4_v0 = vld [vmem:[%s48_s0] sm:$0x3]  ;;  %s28_s0 = smov 124  }
   0x2   :  { %5 = vst [vmem:[#allocation1] sm:$0x3] %v4_v0 }
   0x9   :  { %v9_v1 = vld [vmem:[#allocation1] sm:$0x3]  }
   0xa   :  { %v6_v2 = vld [vmem:[#allocation1] sm:$0x3]   ;;  %10 = vrot.lane.b32.xlu0 %v9_v1, %s28_s0 }
   0xb   :  { %8 = vst.msk [vmem:[#allocation0] ss:$8 sm:$0x3] %vm7_vm0, %v6_v2  }
  0x7c   :  { %v11_v3 = vpop.permute.xlu0 %10  }
  0x7d   :  { %14 = vst.msk [vmem:[#allocation0 + $0x1] ss:$8 sm:$0x3] %vm7_vm0, %v11_v3  }
  0x84   :  { %v18_v4 = vld [vmem:[#allocation0] sm:$0x3]  ;;  %v22_v5 = vld [vmem:[#allocation0 + $0x8] sm:$0x3] }
  0x85   :  { %20 = vst [vmem:[%s49_s1] sm:$0x3] %v18_v4  ;;  %26 = vst [vmem:[%s49_s1 + $0x2] sm:$0x3] %v22_v5 }

// kernel: upsample_forward.3
= control target key start
LH: loop header
LB: loop body
LE: loop exit
PB: predicated region body
PF: predicated region fallthrough
CT: control target
= control target key end

     0   :  { %s1531_s0 = inlined_call_operand.hbm [shape: f32[2,2,8,16,34], index: 0, kind: input, shape index: {}]   ;;  %s1532_s1 = inlined_call_operand.hbm [shape: f32[2,8,16,1], index: 1, kind: input, shape index: {}]   ;;  %s1533_s2 = inlined_call_operand.hbm [shape: f32[2,8,16,1], index: 2, kind: input, shape index: {}]   ;;  %s1534_s3 = inlined_call_operand.hbm [shape: f32[2,8,32,32], index: 3, kind: output, shape index: {}]  }
   0x1   :  { %1555 = sst [smem:[#allocation23_spill]] %s1532_s1 }
   0x2   :  { %1556 = sst [smem:[#allocation24_spill]] %s1534_s3 }
   0x3   :  { %8 = vsyncpa [#allocation3], 0 }
   0x4   :  { %10 = vsyncpa [#allocation3 + $0x1], 0 }
   0x5   :  { %11 = vsyncpa [#allocation6], 0 }
   0x6   :  { %13 = vsyncpa [#allocation6 + $0x1], 0 }
   0x7   :  { %14 = vsyncpa [#allocation4], 0 }
   0x8   :  { %16 = vsyncpa [#allocation4 + $0x1], 0  ;;  %s1100_s12 = smov 0   ;;  %s1102_s13 = smov 0  }
   0x9   :  { %s1104_s14 = smov 0   ;;  %s1106_s15 = smov 0  }
   0xa   :  { %s1108_s16 = smov 0   ;;  %s1110_s17 = smov 0  }
   0xb   :  { %s1112_s18 = smov 0   ;;  %s1114_s19 = smov 0  }
   0xc   :  { %s1116_s20 = smov 0   ;;  %s1118_s21 = smov 0  }
   0xd   :  { %s1120_s22 = smov 0  }
   0xe LB: > { %1557 = sst [smem:[#allocation14_spill]] %s1029_s13  ;;  %s1154_s23 = sadd.s32 4294967295, %s1065_s22   ;;  %s1065_s22 = sphi %s1120_s22, %s22_s22   ;;  %s1061_s21 = sphi %s1118_s21, %s1608_s21   ;;  %s1057_s20 = sphi %s1116_s20, %s1607_s20   ;;  %s1053_s19 = sphi %s1114_s19, %s1606_s19   ;;  %s1049_s18 = sphi %s1112_s18, %s1605_s18   ;;  %s1045_s17 = sphi %s1110_s17, %s1604_s17   ;;  %s1041_s16 = sphi %s1108_s16, %s1603_s16   ;;  %s1037_s15 = sphi %s1106_s15, %s1602_s15   ;;  %s1033_s14 = sphi %s1104_s14, %s1601_s14   ;;  %s1029_s13 = sphi %s1102_s13, %s1600_s13   ;;  %s1025_s12 = sphi %s1100_s12, %s1598_s12  }
   0xf   : > { %1558 = sst [smem:[#allocation15_spill]] %s1037_s15  ;;  %p1537_p0 = scmp.eq.s32.totalorder %s1065_s22, 0 }
  0x10   : > { %1559 = sst [smem:[#allocation16_spill]] %s1049_s18  ;;  %p1536_p1 = scmp.eq.s32.totalorder %s1154_s23, 0 }
  0x11   : > { %1560 = sst [smem:[#allocation17_spill]] %s1053_s19  ;;  %p76_p2 = scmp.ne.s32.totalorder %s1033_s14, %s1029_s13 }
  0x12   : > { %1561 = sst [smem:[#allocation18_spill]] %s1154_s23  ;;  %p82_p3 = scmp.ne.s32.totalorder %s1029_s13, %s1025_s12 }
  0x13   : > { %p78_p4 = por %p76_p2, %p1537_p0  ;;  %p1535_p5 = scmp.lt.s32.totalorder %s1065_s22, 4 }
  0x14   : > { %p1167_p6 = por %p82_p3, %p1536_p1  ;;  %s183_s26 = sand.u32 1, %s1065_s22  }
  0x15   : > { %s185_s27 = sand.u32 1, %s1033_s14   ;;  %s745_s29 = sshll.u32 %s1061_s21, 11 }
  0x16   : > { %s1562_s25 = scalar_select %p1167_p6, 1, 0 }
  0x17   : > { %s1173_s28 = sshll.u32 %s185_s27, 7  ;;  %s1564_s1 = sld [smem:[#allocation23_spill]] }
  0x18   : > { %1563 = sst [smem:[#allocation19_spill]] %s1562_s25  ;;  %s187_s6 = scalar_lea.vmem [#allocation5], %s1173_s28 }
  0x19   : > { %s194_s7 = sshll.u32 %s187_s6, 4  ;;  %p1186_p7 = pnand %p1535_p5, %p78_p4  ;;  %s1191_s7 = int_to_ptr.vmem [resolvable:$true] %s194_s7 }
  0x1a   : > { %s1193_s10 = scalar_lea.sflag [#allocation6], %s183_s26 }
  0x1b   : > { %p1538_p9 = pneg %p1186_p7 }
  0x1d   : > { %s1181_s5 = scalar_lea.hbm %s1564_s1, %s745_s29  ;;  %s882_s30 = scalar_lea.hbm %s1564_s1, 4096 }
  0x1e   : > { %s877_s11 = scalar_lea.hbm %s1181_s5, 2048  ;;  %p883_p12 = scmp.lt.u32.totalorder %s1181_s5, %s1564_s1 }
  0x1f   : > { %p878_p8 = scmp.ne.s32.totalorder %s1181_s5, %s877_s11  ;;  %p884_p13 = scmp.lt.u32.totalorder %s882_s30, %s877_s11 }
  0x20   : > { %p886_p3 = scmp.lt.u32.totalorder %s877_s11, %s1181_s5 }
  0x21   : > { %p880_p10 = pnand %p1538_p9, %p878_p8  ;;  %p885_p2 = por %p884_p13, %p883_p12 }
  0x23   : > { %p881_p11 = pneg %p880_p10  ;;  %p887_p4 = por %p886_p3, %p885_p2 }
  0x25   : > { %p888_p5 = pnand %p887_p4, %p881_p11 }
  0x27   : > { %891 = shalt.err (!%p888_p5)
}
  0x28   : > { %s892_s26 = scalar_lea.vmem %s1191_s7, 2048  ;;  %s1067_s12 = smov [#allocation5]  }
  0x29   : > { %p893_p8 = scmp.ne.s32.totalorder %s1191_s7, %s892_s26  ;;  %s897_s27 = sshll.u32 %s1067_s12, 4  ;;  %s898_s27 = int_to_ptr.vmem [resolvable:$false] %s897_s27 }
  0x2a   : > { %s899_s4 = scalar_lea.vmem %s898_s27, 4096  ;;  %p900_p0 = scmp.lt.s32.totalorder %s1191_s7, %s898_s27 }
  0x2b   : > { %p895_p10 = pnand %p893_p8, %p1538_p9  ;;  %p901_p12 = scmp.lt.s32.totalorder %s899_s4, %s892_s26 }
  0x2d   : > { %p896_p1 = pneg %p895_p10  ;;  %p902_p13 = por %p901_p12, %p900_p0 }
  0x2f   : > { %p903_p2 = pnand %p902_p13, %p896_p1 }
  0x31   : > { %906 = shalt.err (!%p903_p2)
}
  0x32   : > { %s1539_s11 = smov 128   ;;  %s1541_s30 = smov 8  }
  0x33   : > { %767 = dma.hbm_to_vmem [thread:$0]  (!%p1186_p7), %s1181_s5, 2048, %s1191_s7, %s1193_s10, %s1539_s11, %s1539_s11, %s1541_s30  }
  0x34   : > { %s1229_s12 = scalar_lea.hbm %s1533_s2, %s745_s29  ;;  %p734_p0 = scmp.ge.s32.totalorder %s1065_s22, 1 }
  0x35   : > { %s208_s27 = scalar_lea.vmem [#allocation7], %s1173_s28  ;;  %p223_p1 = scmp.lt.s32.totalorder %s1065_s22, 5 }
  0x36   : > { %s1233_s4 = sshll.u32 %s208_s27, 4  ;;  %s721_s24 = sadd.s32 4294967294, %s1065_s22   ;;  %s1301_s4 = int_to_ptr.vmem [resolvable:$true] %s1233_s4 }
  0x37   : > { %p1236_p5 = pnand %p734_p0, %p223_p1  ;;  %s31_s5 = sadd.s32 1, %s1057_s20 }
  0x38   : > { %s43_s7 = sadd.s32 1, %s1045_s17  ;;  %p32_p11 = scmp.ge.s32.totalorder %s31_s5, 2 }
  0x39   : > { %s1566_s9 = scalar_select %p1236_p5, 1, 0 }
  0x3a   : > { %p50_p3 = scmp.ne.s32.totalorder %s1045_s17, %s1041_s16  ;;  %p56_p4 = scmp.ne.s32.totalorder %s1041_s16, %s1037_s15 }
  0x3b   : > { %p134_p8 = scmp.eq.s32.totalorder %s1154_s23, 3  ;;  %s1610_s5 = smov (%p32_p11, %s31_s5), 0 }
  0x3c   : > { %1567 = sst [smem:[#allocation20_spill]] %s1610_s5  ;;  %s1568_s28 = sadd.s32 1, %s1061_s21 }
  0x3d   : > { %s1612_s28 = smov (!%p32_p11, %s1568_s28), %s1061_s21  ;;  %s39_s29 = ssub.s32 %s1057_s20, %s1610_s5 }
  0x3e   : > { %p1569_p10 = scmp.eq.s32.totalorder %s1065_s22, 0  ;;  %p36_p13 = scmp.ge.s32.totalorder %s1612_s28, 2 }
  0x3f   : > { %p1571_p2 = scmp.eq.s32.totalorder %s1154_s23, 0  ;;  %p1267_p1 = por %p134_p8, %p50_p3 }
  0x40   : > { %p1257_p12 = por %p1569_p10, %p50_p3  ;;  %p140_p11 = scmp.eq.s32.totalorder %s721_s24, 3 }
  0x41   : > { %p1263_p0 = por %p1571_p2, %p56_p4  ;;  %s1614_s28 = smov (%p36_p13, %s1612_s28), 0 }
  0x42   : > { %s1573_s27 = scalar_select %p1267_p1, 1, 0 }
  0x43   : > { %s1572_s26 = scalar_select %p1263_p0, 1, 0 }
  0x44   : > { %1574 = sst [smem:[#allocation21_spill]] %s1573_s27  ;;  %p1273_p9 = por %p140_p11, %p56_p4 }
  0x45   : > { %s160_s30 = sand.u32 1, %s1045_s17   ;;  %s38_s1 = ssub.s32 %s1061_s21, %s1614_s28 }
  0x46   : > { %s1575_s11 = scalar_select %p1273_p9, 1, 0 }
  0x47   : > { %s40_s5 = sor.u32 %s39_s29, %s38_s1  ;;  %p67_p10 = scmp.eq.s32.totalorder %s38_s1, 0 }
  0x48   : > { %1576 = sst [smem:[#allocation22_spill]] %s1575_s11  ;;  %p41_p2 = scmp.eq.s32.totalorder %s40_s5, 0 }
  0x49   : > { %s724_s15 = sshll.u32 %s160_s30, 7  ;;  %s1577_s3 = sadd.s32 1, %s1033_s14 }
  0x4a   : > { %s1283_s19 = scalar_select %p67_p10, %s1033_s14, %s1577_s3  }
  0x4b   : > { %s1286_s24 = scalar_select %p41_p2, %s1045_s17, %s43_s7  }
  0x4c   : > { %s725_s27 = sshll.u32 %s1057_s20, 4  ;;  %s726_s18 = sshll.u32 %s1061_s21, 5 }
  0x4d   : > { %s164_s25 = scalar_lea.vmem [#allocation2], %s724_s15  ;;  %s170_s23 = sadd.s32 %s726_s18, %s725_s27 }
  0x4e   : > { %s173_s13 = sshll.u32 %s164_s25, 4  ;;  %s727_s11 = sshll.u32 %s170_s23, 7  ;;  %s1290_s13 = int_to_ptr.vmem [resolvable:$true] %s173_s13 }
  0x4f   : > { %p1578_p3 = scmp.lt.s32.totalorder %s1065_s22, 4  ;;  %s1306_s5 = scalar_lea.hbm %s1531_s0, %s727_s11 }
  0x50   : > { %s1308_s15 = scalar_lea.sflag [#allocation3], %s160_s30  ;;  %s907_s18 = scalar_lea.hbm %s1306_s5, 2048 }
  0x51   : > { %p1296_p4 = pnand %p1578_p3, %p1257_p12  ;;  %p908_p8 = scmp.ne.s32.totalorder %s1306_s5, %s907_s18 }
  0x52   : > { %s912_s7 = scalar_lea.hbm %s1531_s0, 8192  ;;  %p913_p10 = scmp.lt.u32.totalorder %s1306_s5, %s1531_s0 }
  0x53   : > { %p909_p12 = pneg %p1296_p4  ;;  %p914_p2 = scmp.lt.u32.totalorder %s912_s7, %s907_s18 }
  0x54   : > { %p916_p9 = scmp.lt.u32.totalorder %s907_s18, %s1306_s5 }
  0x55   : > { %p910_p13 = pnand %p909_p12, %p908_p8  ;;  %p915_p3 = por %p914_p2, %p913_p10 }
  0x57   : > { %p911_p11 = pneg %p910_p13  ;;  %p917_p1 = por %p916_p9, %p915_p3 }
  0x59   : > { %p918_p6 = pnand %p917_p1, %p911_p11 }
  0x5b   : > { %921 = shalt.err (!%p918_p6)
}
  0x5c   : > { %s922_s30 = scalar_lea.vmem %s1290_s13, 2048  ;;  %s1070_s27 = smov [#allocation2]  }
  0x5d   : > { %p923_p8 = scmp.ne.s32.totalorder %s1290_s13, %s922_s30  ;;  %s927_s1 = sshll.u32 %s1070_s27, 4  ;;  %s928_s1 = int_to_ptr.vmem [resolvable:$false] %s927_s1 }
  0x5e   : > { %s929_s3 = scalar_lea.vmem %s928_s1, 4096  ;;  %p930_p5 = scmp.lt.s32.totalorder %s1290_s13, %s928_s1 }
  0x5f   : > { %p925_p13 = pnand %p923_p8, %p909_p12  ;;  %p931_p10 = scmp.lt.s32.totalorder %s929_s3, %s922_s30 }
  0x61   : > { %p926_p0 = pneg %p925_p13  ;;  %p932_p2 = por %p931_p10, %p930_p5 }
  0x63   : > { %p933_p9 = pnand %p932_p2, %p926_p0 }
  0x65   : > { %936 = shalt.err (!%p933_p9)
}
  0x66   : > { %s1580_s18 = smov 8   ;;  %s1581_s23 = smov 128  }
  0x67   : > { %764 = dma.hbm_to_vmem [thread:$0]  (!%p1296_p4), %s1306_s5, 2048, %s1290_s13, %s1308_s15, %s1581_s23, %s1581_s23, %s1580_s18  }
  0x68   : > { %s937_s25 = scalar_lea.hbm %s1229_s12, 2048  ;;  %p1582_p5 = pneg %p1186_p7 }
  0x69   : > { %p938_p6 = scmp.ne.s32.totalorder %s1229_s12, %s937_s25  ;;  %s942_s11 = scalar_lea.hbm %s1533_s2, 4096 }
  0x6a   : > { %p943_p12 = scmp.lt.u32.totalorder %s1229_s12, %s1533_s2  ;;  %p944_p11 = scmp.lt.u32.totalorder %s942_s11, %s937_s25 }
  0x6b   : > { %p940_p0 = pnand %p938_p6, %p1582_p5  ;;  %p946_p8 = scmp.lt.u32.totalorder %s937_s25, %s1229_s12 }
  0x6c   : > { %p945_p3 = por %p944_p11, %p943_p12 }
  0x6d   : > { %p941_p1 = pneg %p940_p0 }
  0x6e   : > { %p947_p13 = por %p946_p8, %p945_p3 }
  0x70   : > { %p948_p10 = pnand %p947_p13, %p941_p1 }
  0x72   : > { %951 = shalt.err (!%p948_p10)
}
  0x73   : > { %s952_s13 = scalar_lea.vmem %s1301_s4, 2048  ;;  %p1583_p2 = pmov %p1582_p5 }
  0x74   : > { %p953_p4 = scmp.ne.s32.totalorder %s1301_s4, %s952_s13  ;;  %s1071_s5 = smov [#allocation7]  }
  0x75   : > { %s957_s15 = sshll.u32 %s1071_s5, 4  ;;  %s958_s15 = int_to_ptr.vmem [resolvable:$false] %s957_s15 }
  0x76   : > { %p955_p9 = pnand %p953_p4, %p1583_p2  ;;  %s959_s27 = scalar_lea.vmem %s958_s15, 4096 }
  0x77   : > { %p960_p5 = scmp.lt.s32.totalorder %s1301_s4, %s958_s15  ;;  %p961_p0 = scmp.lt.s32.totalorder %s959_s27, %s952_s13 }
  0x78   : > { %p956_p6 = pneg %p955_p9 }
  0x79   : > { %p962_p12 = por %p961_p0, %p960_p5 }
  0x7b   : > { %p963_p11 = pnand %p962_p12, %p956_p6 }
  0x7d   : > { %966 = shalt.err (!%p963_p11)
}
  0x7e   : > { %770 = dma.hbm_to_vmem [thread:$0]  (!%p1186_p7), %s1229_s12, 2048, %s1301_s4, %s1193_s10, %s1581_s23, %s1581_s23, %s1580_s18  }
  0x7f   : > { %p1584_p1 = scmp.ne.s32.totalorder %s1566_s9, 0 }
  0x80   : > { %s1369_s1 = sand.u32 (!%p1584_p1), 1, %s1041_s16   ;;  %p1585_p3 = scmp.ne.s32.totalorder (!%p1584_p1), %s1572_s26, 0 }
  0x81   : > { %227 = sbr.rel (%p1584_p1) target bundleno = 357 (0x165), region = 32  ;;  %s735_s3 = sshll.u32 (!%p1584_p1), %s1369_s1, 7 }
  0x82   : > { %s230_s25 = scalar_lea.sflag (!%p1584_p1), [#allocation3], %s1369_s1  ;;  %s1375_s8 = scalar_lea.vmem (!%p1584_p1), [#allocation2], %s735_s3 }
  0x88   : > { %1012 = dma.done.wait (%p1585_p3), %s230_s25, 2048  }
  0x89   : > { %1014 = vsyncadd (%p1585_p3), %s230_s25, 4294965248  ;;  %s1586_s10 = sld [smem:[#allocation18_spill]]  ;;  %s1587_s9 = sld [smem:[#allocation14_spill]] }
  0x8a   : > { %s1588_s12 = sld [smem:[#allocation19_spill]] }
  0x8f   : > { %s238_s4 = sand.u32 1, %s1586_s10   ;;  %s240_s18 = sand.u32 1, %s1587_s9  }
  0x90   : > { %s1383_s23 = sshll.u32 %s240_s18, 7  ;;  %s239_s7 = scalar_lea.sflag [#allocation6], %s238_s4 }
  0x91   : > { %s1386_s29 = scalar_lea.vmem [#allocation5], %s1383_s23  ;;  %p1589_p7 = scmp.ne.s32.totalorder %s1588_s12, 0 }
  0x93   : > { %1016 = dma.done.wait (%p1589_p7), %s239_s7, 4096  }
  0x94   : > { %1018 = vsyncadd (%p1589_p7), %s239_s7, 4294963200  ;;  %v1072_v0 = vmov 0   ;;  %v303_v1 = vld [vmem:[%s1386_s29 + $0x10] sm:$0xff]  ;;  %v301_v2 = vld [vmem:[%s1386_s29] sm:$0xff]  ;;  %s251_s26 = scalar_lea.vmem [#allocation7], %s1383_s23  ;;  %vm525_vm0 = vcmask 261120  }
  0x95   : > { %876 = vset.pattern.permute.xlu1 %v1072_v0  ;;  %875 = vset.pattern.permute.xlu0 %v1072_v0  ;;  %v304_v3 = vld [vmem:[%s1386_s29 + $0x18] sm:$0xff]  ;;  %v302_v4 = vld [vmem:[%s1386_s29 + $0x8] sm:$0xff]  ;;  %v305_v6 = vld [vmem:[%s1386_s29 + $0x20] sm:$0xff]  ;;  %s1423_s11 = scalar_lea.vmem [#allocation8], %s735_s3  ;;  %s543_s6 = scalar_lea.sflag [#allocation4], %s1369_s1 }
  0x96   : > { %329 = vperm.xlu1 %876, %v303_v1   ;;  %319 = vperm.xlu0 %875, %v301_v2   ;;  %v306_v5 = vld [vmem:[%s1386_s29 + $0x28] sm:$0xff]  ;;  %v308_v7 = vld [vmem:[%s1386_s29 + $0x38] sm:$0xff]  ;;  %v307_v8 = vld [vmem:[%s1386_s29 + $0x30] sm:$0xff] }
  0x97   : > { %v310_v9 = vld [vmem:[%s1386_s29 + $0x48] sm:$0xff]  ;;  %v309_v10 = vld [vmem:[%s1386_s29 + $0x40] sm:$0xff]  ;;  %v312_v11 = vld [vmem:[%s1386_s29 + $0x58] sm:$0xff] }
  0x98   : > { %v311_v12 = vld [vmem:[%s1386_s29 + $0x50] sm:$0xff]  ;;  %v314_v13 = vld [vmem:[%s1386_s29 + $0x68] sm:$0xff]  ;;  %v313_v14 = vld [vmem:[%s1386_s29 + $0x60] sm:$0xff] }
  0x99   : > { %v316_v15 = vld [vmem:[%s1386_s29 + $0x78] sm:$0xff]  ;;  %v315_v16 = vld [vmem:[%s1386_s29 + $0x70] sm:$0xff]  ;;  %v414_v17 = vld [vmem:[%s251_s26 + $0x8] sm:$0xff] }
  0x9a   : > { %334 = vperm.xlu1 %876, %v304_v3   ;;  %324 = vperm.xlu0 %875, %v302_v4   ;;  %v413_v18 = vld [vmem:[%s251_s26] sm:$0xff]  ;;  %v416_v19 = vld [vmem:[%s251_s26 + $0x18] sm:$0xff]  ;;  %v415_v20 = vld [vmem:[%s251_s26 + $0x10] sm:$0xff] }
  0x9b   : > { %v418_v21 = vld [vmem:[%s251_s26 + $0x28] sm:$0xff]  ;;  %v417_v22 = vld [vmem:[%s251_s26 + $0x20] sm:$0xff]  ;;  %v420_v23 = vld [vmem:[%s251_s26 + $0x38] sm:$0xff] }
  0x9c   : > { %v419_v24 = vld [vmem:[%s251_s26 + $0x30] sm:$0xff]  ;;  %v422_v25 = vld [vmem:[%s251_s26 + $0x48] sm:$0xff]  ;;  %v421_v26 = vld [vmem:[%s251_s26 + $0x40] sm:$0xff] }
  0x9d   : > { %v424_v27 = vld [vmem:[%s251_s26 + $0x58] sm:$0xff]  ;;  %v423_v28 = vld [vmem:[%s251_s26 + $0x50] sm:$0xff]  ;;  %v426_v29 = vld [vmem:[%s251_s26 + $0x68] sm:$0xff] }
  0x9e   : > { %344 = vperm.xlu1 %876, %v306_v5   ;;  %339 = vperm.xlu0 %875, %v305_v6   ;;  %v425_v30 = vld [vmem:[%s251_s26 + $0x60] sm:$0xff]  ;;  %v428_v31 = vld [vmem:[%s251_s26 + $0x78] sm:$0xff]  ;;  %v427_v32 = vld [vmem:[%s251_s26 + $0x70] sm:$0xff] }
  0x9f   : > { %v285_v47 = vld [vmem:[%s1375_s8] sm:$0xff]  ;;  %v286_v48 = vld [vmem:[%s1375_s8 + $0x8] sm:$0xff]  ;;  %v287_v53 = vld [vmem:[%s1375_s8 + $0x10] sm:$0xff] }
  0xa0   : > { %v288_v54 = vld [vmem:[%s1375_s8 + $0x18] sm:$0xff]  ;;  %v290_v61 = vld [vmem:[%s1375_s8 + $0x28] sm:$0xff]  ;;  %v289_v62 = vld [vmem:[%s1375_s8 + $0x20] sm:$0xff] }
  0xa1   : > { %v292_v5 = vld [vmem:[%s1375_s8 + $0x38] sm:$0xff]  ;;  %v291_v6 = vld [vmem:[%s1375_s8 + $0x30] sm:$0xff] }
  0xa2   : > { %354 = vperm.xlu1 %876, %v308_v7   ;;  %349 = vperm.xlu0 %875, %v307_v8  }
  0xa6   : > { %364 = vperm.xlu1 %876, %v310_v9   ;;  %359 = vperm.xlu0 %875, %v309_v10  }
  0xaa   : > { %374 = vperm.xlu1 %876, %v312_v11   ;;  %369 = vperm.xlu0 %875, %v311_v12  }
  0xae   : > { %384 = vperm.xlu1 %876, %v314_v13   ;;  %379 = vperm.xlu0 %875, %v313_v14   ;;  %v294_v13 = vld [vmem:[%s1375_s8 + $0x48] sm:$0xff]  ;;  %v293_v14 = vld [vmem:[%s1375_s8 + $0x40] sm:$0xff] }
  0xb2   : > { %394 = vperm.xlu1 %876, %v316_v15   ;;  %389 = vperm.xlu0 %875, %v315_v16  }
  0xb6   : > { %436 = vperm.xlu1 %876, %v414_v17   ;;  %431 = vperm.xlu0 %875, %v413_v18  }
  0xba   : > { %446 = vperm.xlu1 %876, %v416_v19   ;;  %441 = vperm.xlu0 %875, %v415_v20  }
  0xbe   : > { %456 = vperm.xlu1 %876, %v418_v21   ;;  %451 = vperm.xlu0 %875, %v417_v22   ;;  %v296_v21 = vld [vmem:[%s1375_s8 + $0x58] sm:$0xff]  ;;  %v295_v22 = vld [vmem:[%s1375_s8 + $0x50] sm:$0xff] }
  0xc2   : > { %466 = vperm.xlu1 %876, %v420_v23   ;;  %461 = vperm.xlu0 %875, %v419_v24  }
  0xc6   : > { %476 = vperm.xlu1 %876, %v422_v25   ;;  %471 = vperm.xlu0 %875, %v421_v26  }
  0xca   : > { %486 = vperm.xlu1 %876, %v424_v27   ;;  %481 = vperm.xlu0 %875, %v423_v28  }
  0xce   : > { %496 = vperm.xlu1 %876, %v426_v29   ;;  %491 = vperm.xlu0 %875, %v425_v30   ;;  %v298_v29 = vld [vmem:[%s1375_s8 + $0x68] sm:$0xff]  ;;  %v297_v30 = vld [vmem:[%s1375_s8 + $0x60] sm:$0xff] }
  0xd2   : > { %506 = vperm.xlu1 %876, %v428_v31   ;;  %501 = vperm.xlu0 %875, %v427_v32  }
 0x115   : > { %v330_v33 = vpop.permute.xlu1 %329  ;;  %v320_v34 = vpop.permute.xlu0 %319 }
 0x116   : > { %v397_v51 = vmul.f32 %v320_v34, %v285_v47  ;;  %v399_v59 = vmul.f32 %v330_v33, %v287_v53 }
 0x119   : > { %v335_v35 = vpop.permute.xlu1 %334  ;;  %v325_v36 = vpop.permute.xlu0 %324 }
 0x11a   : > { %v398_v52 = vmul.f32 %v325_v36, %v286_v48  ;;  %v400_v60 = vmul.f32 %v335_v35, %v288_v54 }
 0x11d   : > { %v345_v37 = vpop.permute.xlu1 %344  ;;  %v340_v38 = vpop.permute.xlu0 %339 }
 0x11e   : > { %v402_v3 = vmul.f32 %v345_v37, %v290_v61  ;;  %v401_v4 = vmul.f32 %v340_v38, %v289_v62  ;;  %v300_v37 = vld [vmem:[%s1375_s8 + $0x78] sm:$0xff]  ;;  %v299_v38 = vld [vmem:[%s1375_s8 + $0x70] sm:$0xff] }
 0x121   : > { %v355_v39 = vpop.permute.xlu1 %354  ;;  %v350_v40 = vpop.permute.xlu0 %349 }
 0x122   : > { %v404_v11 = vmul.f32 %v355_v39, %v292_v5  ;;  %v403_v12 = vmul.f32 %v350_v40, %v291_v6 }
 0x125   : > { %v365_v41 = vpop.permute.xlu1 %364  ;;  %v360_v42 = vpop.permute.xlu0 %359 }
 0x126   : > { %v406_v19 = vmul.f32 %v365_v41, %v294_v13  ;;  %v405_v20 = vmul.f32 %v360_v42, %v293_v14 }
 0x129   : > { %v375_v43 = vpop.permute.xlu1 %374  ;;  %v370_v44 = vpop.permute.xlu0 %369 }
 0x12a   : > { %v408_v27 = vmul.f32 %v375_v43, %v296_v21  ;;  %v407_v28 = vmul.f32 %v370_v44, %v295_v22 }
 0x12d   : > { %v1409_v45 = vpop.permute.xlu1 %384  ;;  %v1411_v46 = vpop.permute.xlu0 %379 }
 0x12e   : > { %v410_v35 = vmul.f32 %v1409_v45, %v298_v29  ;;  %v409_v36 = vmul.f32 %v1411_v46, %v297_v30 }
 0x131   : > { %v1415_v49 = vpop.permute.xlu1 %394  ;;  %v1417_v50 = vpop.permute.xlu0 %389 }
 0x132   : > { %v412_v43 = vmul.f32 %v1415_v49, %v300_v37  ;;  %v411_v44 = vmul.f32 %v1417_v50, %v299_v38 }
 0x135   : > { %v437_v55 = vpop.permute.xlu1 %436  ;;  %v432_v56 = vpop.permute.xlu0 %431 }
 0x136   : > { %v510_v57 = vadd.f32 %v437_v55, %v398_v52  ;;  %v509_v58 = vadd.f32 %v432_v56, %v397_v51 }
 0x138   : > { %527 = vst.msk [vmem:[%s1423_s11 + $0x8] sm:$0xff] %vm525_vm0, %v510_v57  ;;  %526 = vst.msk [vmem:[%s1423_s11] sm:$0xff] %vm525_vm0, %v509_v58 }
 0x139   : > { %v447_v63 = vpop.permute.xlu1 %446  ;;  %v442_v0 = vpop.permute.xlu0 %441 }
 0x13a   : > { %v512_v1 = vadd.f32 %v447_v63, %v400_v60  ;;  %v511_v2 = vadd.f32 %v442_v0, %v399_v59 }
 0x13c   : > { %529 = vst.msk [vmem:[%s1423_s11 + $0x18] sm:$0xff] %vm525_vm0, %v512_v1  ;;  %528 = vst.msk [vmem:[%s1423_s11 + $0x10] sm:$0xff] %vm525_vm0, %v511_v2 }
 0x13d   : > { %v457_v7 = vpop.permute.xlu1 %456  ;;  %v452_v8 = vpop.permute.xlu0 %451 }
 0x13e   : > { %v514_v9 = vadd.f32 %v457_v7, %v402_v3  ;;  %v513_v10 = vadd.f32 %v452_v8, %v401_v4 }
 0x140   : > { %531 = vst.msk [vmem:[%s1423_s11 + $0x28] sm:$0xff] %vm525_vm0, %v514_v9  ;;  %530 = vst.msk [vmem:[%s1423_s11 + $0x20] sm:$0xff] %vm525_vm0, %v513_v10 }
 0x141   : > { %v467_v15 = vpop.permute.xlu1 %466  ;;  %v462_v16 = vpop.permute.xlu0 %461 }
 0x142   : > { %v516_v17 = vadd.f32 %v467_v15, %v404_v11  ;;  %v515_v18 = vadd.f32 %v462_v16, %v403_v12 }
 0x144   : > { %533 = vst.msk [vmem:[%s1423_s11 + $0x38] sm:$0xff] %vm525_vm0, %v516_v17  ;;  %532 = vst.msk [vmem:[%s1423_s11 + $0x30] sm:$0xff] %vm525_vm0, %v515_v18 }
 0x145   : > { %v477_v23 = vpop.permute.xlu1 %476  ;;  %v472_v24 = vpop.permute.xlu0 %471 }
 0x146   : > { %v518_v25 = vadd.f32 %v477_v23, %v406_v19  ;;  %v517_v26 = vadd.f32 %v472_v24, %v405_v20 }
 0x148   : > { %535 = vst.msk [vmem:[%s1423_s11 + $0x48] sm:$0xff] %vm525_vm0, %v518_v25  ;;  %534 = vst.msk [vmem:[%s1423_s11 + $0x40] sm:$0xff] %vm525_vm0, %v517_v26 }
 0x149   : > { %v487_v31 = vpop.permute.xlu1 %486  ;;  %v482_v32 = vpop.permute.xlu0 %481 }
 0x14a   : > { %v520_v33 = vadd.f32 %v487_v31, %v408_v27  ;;  %v519_v34 = vadd.f32 %v482_v32, %v407_v28 }
 0x14c   : > { %537 = vst.msk [vmem:[%s1423_s11 + $0x58] sm:$0xff] %vm525_vm0, %v520_v33  ;;  %536 = vst.msk [vmem:[%s1423_s11 + $0x50] sm:$0xff] %vm525_vm0, %v519_v34 }
 0x14d   : > { %v497_v39 = vpop.permute.xlu1 %496  ;;  %v492_v40 = vpop.permute.xlu0 %491 }
 0x14e   : > { %v522_v41 = vadd.f32 %v497_v39, %v410_v35  ;;  %v521_v42 = vadd.f32 %v492_v40, %v409_v36 }
 0x150   : > { %539 = vst.msk [vmem:[%s1423_s11 + $0x68] sm:$0xff] %vm525_vm0, %v522_v41  ;;  %538 = vst.msk [vmem:[%s1423_s11 + $0x60] sm:$0xff] %vm525_vm0, %v521_v42 }
 0x151   : > { %v507_v45 = vpop.permute.xlu1 %506  ;;  %v502_v46 = vpop.permute.xlu0 %501 }
 0x152   : > { %v524_v47 = vadd.f32 %v507_v45, %v412_v43  ;;  %v523_v48 = vadd.f32 %v502_v46, %v411_v44 }
 0x154   : > { %541 = vst.msk [vmem:[%s1423_s11 + $0x78] sm:$0xff] %vm525_vm0, %v524_v47  ;;  %540 = vst.msk [vmem:[%s1423_s11 + $0x70] sm:$0xff] %vm525_vm0, %v523_v48 }
 0x155   : > { %s1590_s30 = sld [smem:[#allocation16_spill]]  ;;  %s1591_s13 = sld [smem:[#allocation17_spill]] }
 0x156   : > { %s1592_s5 = sld [smem:[#allocation21_spill]]  ;;  %s574_s25 = sshll.u32 %s1423_s11, 4  ;;  %s575_s25 = int_to_ptr.vmem [resolvable:$true] %s574_s25 }
 0x157   : > { %s1593_s12 = sld [smem:[#allocation24_spill]]  ;;  %s1073_s4 = smov 256  }
 0x158   : > { %s1074_s18 = smov 512   ;;  %s1075_s23 = smov 2  }
 0x159   : > { %s1076_s7 = smov 128   ;;  %s1077_s29 = smov 8  }
 0x15a   : > { %s1078_s26 = smov [#allocation9]   ;;  %s1079_s11 = smov 0  }
 0x15b   : > { %s740_s15 = sshll.u32 %s1590_s30, 1  ;;  %s741_s27 = sshll.u32 %s1591_s13, 5 }
 0x15c   : > { %s555_s3 = sadd.s32 %s741_s27, %s740_s15  ;;  %p1594_p8 = scmp.ne.s32.totalorder %s1592_s5, 0 }
 0x15d   : > { %s742_s8 = sshll.u32 %s555_s3, 7 }
 0x15e   : > { %s557_s1 = scalar_lea.hbm %s1593_s12, %s742_s8  ;;  %753 = sst [smem:[#allocation10]] (%p1594_p8), %s1073_s4 }
 0x15f   : > { %754 = sst [smem:[#allocation10 + $0x1]] (%p1594_p8), %s1074_s18 }
 0x160   : > { %755 = sst [smem:[#allocation10 + $0x2]] (%p1594_p8), %s1075_s23 }
 0x161   : > { %756 = sst [smem:[#allocation10 + $0x3]] (%p1594_p8), %s1076_s7 }
 0x162   : > { %757 = sst [smem:[#allocation10 + $0x4]] (%p1594_p8), %s1076_s7 }
 0x163   : > { %758 = sst [smem:[#allocation10 + $0x5]] (%p1594_p8), %s1077_s29 }
 0x164   : > { %759 = dma.general (%p1594_p8), %s575_s25, 2048, %s557_s1, %s543_s6, %s1078_s26, [#allocation10], %s1079_s11, 0  }
 0x165 PF: > { %s1595_s30 = sld [smem:[#allocation15_spill]]  ;;  %s1596_s13 = sld [smem:[#allocation22_spill]] }
 0x166   : > { %p776_p13 = scmp.ge.s32.totalorder %s1065_s22, 2 }
 0x16b   : > { %s602_s15 = sand.u32 1, %s1595_s30   ;;  %p1597_p10 = scmp.ne.s32.totalorder %s1596_s13, 0 }
 0x16c   : > { %s603_s27 = scalar_lea.sflag [#allocation4], %s602_s15 }
 0x16d   : > { %p772_p4 = pnand %p776_p13, %p1597_p10 }
 0x16f   : > { %1020 = dma.done.wait (!%p772_p4), %s603_s27, 2048  }
 0x170   : > { %1022 = vsyncadd (!%p772_p4), %s603_s27, 4294965248  ;;  %s22_s22 = sadd.s32 1, %s1065_s22   ;;  %s1598_s12 = sld [smem:[#allocation14_spill]] }
 0x171   : > { %p19_p2 = scmp.ge.s32.totalorder %s22_s22, 6   ;;  %s1599_s6 = sld [smem:[#allocation20_spill]] }
 0x172   : > { %s1600_s13 = smov %s1033_s14  ;;  %s1601_s14 = smov %s1283_s19 }
 0x173   : > { %s1602_s15 = smov %s1041_s16  ;;  %s1603_s16 = smov %s1045_s17 }
 0x174   : > { %s1604_s17 = smov %s1286_s24  ;;  %s1605_s18 = smov %s1057_s20 }
 0x175   : > { %s1606_s19 = smov %s1061_s21  ;;  %s1608_s21 = smov %s1614_s28 }
 0x176   :  { %21 = sbr.rel (!%p19_p2) target bundleno = 14 (0xe), region = 106 }
 0x177   : > { %s1607_s20 = smov %s1599_s6 }
 0x17d   :  { %608 = vsyncpa [#allocation3], 1 }
 0x17e   :  { %610 = vsyncpa [#allocation3 + $0x1], 1 }
 0x17f   :  { %611 = vsyncpa [#allocation6], 1 }
 0x180   :  { %613 = vsyncpa [#allocation6 + $0x1], 1 }
 0x181   :  { %614 = vsyncpa [#allocation4], 1 }
 0x182   :  { %616 = vsyncpa [#allocation4 + $0x1], 1 }

// kernel: upsample_forward.2
= control target key start
LH: loop header
LB: loop body
LE: loop exit
PB: predicated region body
PF: predicated region fallthrough
CT: control target
= control target key end

     0   :  { %s4206_s0 = inlined_call_operand.hbm [shape: f32[2,2,4,614], index: 0, kind: input, shape index: {}]   ;;  %s4207_s1 = inlined_call_operand.hbm [shape: f32[9,8,4], index: 1, kind: input, shape index: {}]   ;;  %s4208_s2 = inlined_call_operand.hbm [shape: f32[8,1], index: 2, kind: input, shape index: {}]   ;;  %s4209_s3 = inlined_call_operand.hbm [shape: f32[1,544], index: 3, kind: input, shape index: {}]   ;;  %s4210_s4 = inlined_call_operand.hbm [shape: f32[2,2,8,544], index: 4, kind: output, shape index: {0}]   ;;  %s4211_s5 = inlined_call_operand.hbm [shape: f32[2,8,1], index: 5, kind: output, shape index: {1}]   ;;  %s4212_s6 = inlined_call_operand.hbm [shape: f32[2,8,1], index: 6, kind: output, shape index: {2}]  }
   0x1   :  { %4228 = sst [smem:[#allocation24_spill]] %s4206_s0 }
   0x2   :  { %4229 = sst [smem:[#allocation25_spill]] %s4207_s1 }
   0x3   :  { %4230 = sst [smem:[#allocation26_spill]] %s4208_s2 }
   0x4   :  { %4231 = sst [smem:[#allocation27_spill]] %s4209_s3 }
   0x5   :  { %4232 = sst [smem:[#allocation28_spill]] %s4210_s4 }
   0x6   :  { %4233 = sst [smem:[#allocation29_spill]] %s4211_s5 }
   0x7   :  { %4234 = sst [smem:[#allocation30_spill]] %s4212_s6 }
   0x8   :  { %12 = vsyncpa [#allocation3], 0 }
   0x9   :  { %14 = vsyncpa [#allocation3 + $0x1], 0 }
   0xa   :  { %15 = vsyncpa [#allocation6], 0 }
   0xb   :  { %16 = vsyncpa [#allocation9], 0 }
   0xc   :  { %17 = vsyncpa [#allocation4], 0 }
   0xd   :  { %19 = vsyncpa [#allocation4 + $0x1], 0 }
   0xe   :  { %20 = vsyncpa [#allocation12], 0 }
   0xf   :  { %22 = vsyncpa [#allocation12 + $0x1], 0  ;;  %s3581_s21 = smov 0   ;;  %s3583_s22 = smov 0  }
  0x10   :  { %s3585_s23 = smov 0   ;;  %s3587_s24 = smov 0  }
  0x11   :  { %s3589_s25 = smov 0   ;;  %s3591_s26 = smov 0  }
  0x12   :  { %s3593_s27 = smov 0   ;;  %s3595_s28 = smov 0  }
  0x13   :  { %s3597_s29 = smov 0   ;;  %s3599_s30 = smov 0  }
  0x14   :  { %s3601_s7 = smov 0  }
  0x15 LB: > { %4235 = sst [smem:[#allocation19_spill]] %s3495_s24  ;;  %s3635_s8 = sadd.s32 4294967295, %s3523_s7   ;;  %s3523_s7 = sphi %s3601_s7, %s28_s7   ;;  %s3519_s30 = sphi %s3599_s30, %s4282_s30   ;;  %s3515_s29 = sphi %s3597_s29, %s4281_s29   ;;  %s3511_s28 = sphi %s3595_s28, %s4280_s28   ;;  %s3507_s27 = sphi %s3593_s27, %s4279_s27   ;;  %s3503_s26 = sphi %s3591_s26, %s4278_s26   ;;  %s3499_s25 = sphi %s3589_s25, %s4277_s25   ;;  %s3495_s24 = sphi %s3587_s24, %s4276_s24   ;;  %s3491_s23 = sphi %s3585_s23, %s4275_s23   ;;  %s3487_s22 = sphi %s3583_s22, %s4274_s22   ;;  %s3483_s21 = sphi %s3581_s21, %s4273_s21  }
  0x16   : > { %4236 = sst [smem:[#allocation20_spill]] %s3511_s28  ;;  %s4213_s9 = sadd.s32 4294967294, %s3523_s7  }
  0x17   : > { %p62_p0 = scmp.ne.s32.totalorder %s3499_s25, %s3495_s24  ;;  %p4218_p1 = scmp.eq.s32.totalorder %s3635_s8, 0 }
  0x18   : > { %p4219_p2 = scmp.eq.s32.totalorder %s3635_s8, 3  ;;  %p157_p3 = scmp.eq.s32.totalorder %s4213_s9, 3 }
  0x19   : > { %p3646_p4 = por %p4218_p1, %p62_p0  ;;  %p176_p5 = scmp.ne.s32.totalorder %s3491_s23, %s3487_s22 }
  0x1a   : > { %p3652_p6 = por %p157_p3, %p62_p0  ;;  %p182_p7 = scmp.ne.s32.totalorder %s3487_s22, %s3483_s21 }
  0x1b   : > { %s4237_s10 = scalar_select %p3646_p4, 1, 0 }
  0x1c   : > { %s4238_s11 = scalar_select %p3652_p6, 1, 0 }
  0x1d   : > { %p3659_p8 = por %p176_p5, %p4219_p2  ;;  %p2865_p9 = scmp.ge.s32.totalorder %s3523_s7, 1 }
  0x1e   : > { %4239 = sst [smem:[#allocation21_spill]] %s4238_s11  ;;  %p3664_p10 = por %p182_p7, %p157_p3 }
  0x1f   : > { %s4240_s12 = scalar_select %p3659_p8, 1, 0 }
  0x20   : > { %s4242_s13 = scalar_select %p3664_p10, 1, 0 }
  0x21   : > { %4241 = sst [smem:[#allocation22_spill]] %s4240_s12  ;;  %p216_p11 = scmp.lt.s32.totalorder %s3523_s7, 5 }
  0x22   : > { %4243 = sst [smem:[#allocation23_spill]] %s4242_s13  ;;  %s3525_s15 = smov [#allocation5]  }
  0x23   : > { %p3669_p12 = pnand %p2865_p9, %p216_p11  ;;  %s228_s16 = sshll.u32 %s3525_s15, 4  ;;  %s3673_s16 = int_to_ptr.vmem [resolvable:$true] %s228_s16 }
  0x24   : > { %s3526_s18 = smov [#allocation7]   ;;  %s3527_s20 = smov [#allocation8]  }
  0x25   : > { %s4244_s14 = scalar_select %p3669_p12, 1, 0 }
  0x26   : > { %p3079_p13 = pneg %p3669_p12  ;;  %s242_s19 = sshll.u32 %s3526_s18, 4  ;;  %s3683_s19 = int_to_ptr.vmem [resolvable:$true] %s242_s19 }
  0x27   : > { %s3685_s21 = sshll.u32 %s3527_s20, 4  ;;  %s4246_s1 = sld [smem:[#allocation25_spill]]  ;;  %s254_s21 = int_to_ptr.vmem [resolvable:$true] %s3685_s21 }
  0x28   : > { %p3679_p0 = pnand %p3079_p13, %p4218_p1 }
  0x2a   : > { %p3695_p5 = pneg %p3679_p0 }
  0x2d   : > { %s3219_s15 = scalar_lea.hbm %s4246_s1, 1152 }
  0x2e   : > { %p3220_p3 = scmp.ne.s32.totalorder %s4246_s1, %s3219_s15  ;;  %p3226_p11 = scmp.lt.u32.totalorder %s3219_s15, %s4246_s1 }
  0x30   : > { %p3222_p7 = pnand %p3695_p5, %p3220_p3 }
  0x32   : > { %p3223_p9 = pneg %p3222_p7 }
  0x34   : > { %p3228_p13 = pnand %p3226_p11, %p3223_p9 }
  0x36   : > { %3231 = shalt.err (!%p3228_p13)
}
  0x37   : > { %s3232_s24 = scalar_lea.vmem %s3673_s16, 1152  ;;  %p3240_p6 = scmp.lt.s32.totalorder %s3673_s16, %s3673_s16 }
  0x38   : > { %p3233_p1 = scmp.ne.s32.totalorder %s3673_s16, %s3232_s24  ;;  %p3241_p8 = scmp.lt.s32.totalorder %s3232_s24, %s3232_s24 }
  0x3a   : > { %p3235_p2 = pnand %p3233_p1, %p3695_p5  ;;  %p3242_p3 = por %p3241_p8, %p3240_p6 }
  0x3c   : > { %p3236_p10 = pneg %p3235_p2 }
  0x3e   : > { %p3243_p7 = pnand %p3242_p3, %p3236_p10 }
  0x40   : > { %3246 = shalt.err (!%p3243_p7)
}
  0x41   : > { %s3528_s9 = smov 128   ;;  %s3529_s11 = smov 8  }
  0x42   : > { %3082 = dma.hbm_to_vmem [thread:$0]  (!%p3679_p0), %s4246_s1, 1152, %s3673_s16, [#allocation6], %s3528_s9, %s3528_s9, %s3529_s11  }
  0x43   : > { %s4248_s2 = sld [smem:[#allocation26_spill]] }
  0x49   : > { %s3247_s5 = scalar_lea.hbm %s4248_s2, 128 }
  0x4a   : > { %p3248_p1 = scmp.ne.s32.totalorder %s4248_s2, %s3247_s5  ;;  %p3254_p8 = scmp.lt.u32.totalorder %s3247_s5, %s4248_s2 }
  0x4c   : > { %p3250_p2 = pnand %p3248_p1, %p3695_p5 }
  0x4e   : > { %p3251_p6 = pneg %p3250_p2 }
  0x50   : > { %p3256_p10 = pnand %p3254_p8, %p3251_p6 }
  0x52   : > { %3259 = shalt.err (!%p3256_p10)
}
  0x53   : > { %s3260_s16 = scalar_lea.vmem %s3683_s19, 128  ;;  %p3268_p3 = scmp.lt.s32.totalorder %s3683_s19, %s3683_s19 }
  0x54   : > { %p3261_p9 = scmp.ne.s32.totalorder %s3683_s19, %s3260_s16  ;;  %p3269_p7 = scmp.lt.s32.totalorder %s3260_s16, %s3260_s16 }
  0x56   : > { %p3263_p11 = pnand %p3261_p9, %p3695_p5  ;;  %p3270_p1 = por %p3269_p7, %p3268_p3 }
  0x58   : > { %p3264_p13 = pneg %p3263_p11 }
  0x5a   : > { %p3271_p2 = pnand %p3270_p1, %p3264_p13 }
  0x5c   : > { %3274 = shalt.err (!%p3271_p2)
}
  0x5d   : > { %3085 = dma.hbm_to_vmem [thread:$0]  (!%p3679_p0), %s4248_s2, 128, %s3683_s19, [#allocation6]  }
  0x5e   : > { %s4249_s3 = sld [smem:[#allocation27_spill]] }
  0x64   : > { %s3275_s9 = scalar_lea.hbm %s4249_s3, 80 }
  0x65   : > { %p3276_p6 = scmp.ne.s32.totalorder %s4249_s3, %s3275_s9  ;;  %p3282_p9 = scmp.lt.u32.totalorder %s3275_s9, %s4249_s3 }
  0x67   : > { %p3278_p8 = pnand %p3276_p6, %p3695_p5 }
  0x69   : > { %p3279_p10 = pneg %p3278_p8 }
  0x6b   : > { %p3284_p11 = pnand %p3282_p9, %p3279_p10 }
  0x6d   : > { %3287 = shalt.err (!%p3284_p11)
}
  0x6e   : > { %s3288_s20 = scalar_lea.vmem %s254_s21, 80  ;;  %s3295_s19 = scalar_lea.vmem %s254_s21, 96 }
  0x6f   : > { %p3289_p13 = scmp.ne.s32.totalorder %s254_s21, %s3288_s20  ;;  %p3296_p1 = scmp.lt.s32.totalorder %s254_s21, %s254_s21 }
  0x70   : > { %p3297_p2 = scmp.lt.s32.totalorder %s3295_s19, %s3288_s20 }
  0x71   : > { %p3291_p3 = pnand %p3289_p13, %p3695_p5 }
  0x72   : > { %p3298_p4 = por %p3297_p2, %p3296_p1 }
  0x73   : > { %p3292_p7 = pneg %p3291_p3 }
  0x75   : > { %p3299_p12 = pnand %p3298_p4, %p3292_p7 }
  0x77   : > { %3302 = shalt.err (!%p3299_p12)
}
  0x78   : > { %3088 = dma.hbm_to_vmem [thread:$0]  (!%p3679_p0), %s4249_s3, 80, %s254_s21, [#allocation9]  }
  0x79   : > { %s37_s6 = sadd.s32 1, %s3515_s29  ;;  %s40_s17 = sadd.s32 1, %s3519_s30 }
  0x7a   : > { %p38_p4 = scmp.ge.s32.totalorder %s37_s6, 2  ;;  %p56_p12 = scmp.ne.s32.totalorder %s3503_s26, %s3499_s25 }
  0x7b   : > { %s49_s4 = sadd.s32 1, %s3503_s26  ;;  %p57_p5 = scmp.eq.s32.totalorder %s3523_s7, 0 }
  0x7c   : > { %s4284_s6 = smov (%p38_p4, %s37_s6), 0  ;;  %s4286_s17 = smov (!%p38_p4, %s40_s17), %s3519_s30 }
  0x7d   : > { %p42_p6 = scmp.ge.s32.totalorder %s4286_s17, 2  ;;  %p4250_p8 = scmp.eq.s32.totalorder %s3635_s8, 3 }
  0x7e   : > { %s45_s5 = ssub.s32 %s3515_s29, %s4284_s6  ;;  %p3775_p0 = por %p57_p5, %p56_p12 }
  0x7f   : > { %p3769_p10 = por %p4250_p8, %p56_p12  ;;  %s4288_s17 = smov (%p42_p6, %s4286_s17), 0 }
  0x80   : > { %s166_s12 = sadd.s32 1, %s3491_s23  ;;  %s264_s9 = sand.u32 1, %s3503_s26  }
  0x81   : > { %s44_s11 = ssub.s32 %s3519_s30, %s4288_s17  ;;  %p3106_p9 = scmp.lt.s32.totalorder %s3523_s7, 4 }
  0x82   : > { %s46_s13 = sor.u32 %s45_s5, %s44_s11  ;;  %p164_p11 = scmp.eq.s32.totalorder %s44_s11, 0 }
  0x83   : > { %p47_p13 = scmp.eq.s32.totalorder %s46_s13, 0  ;;  %s3052_s15 = smul.u32 20, %s264_s9 }
  0x84   : > { %s3787_s18 = scalar_select %p164_p11, %s3491_s23, %s166_s12  }
  0x85   : > { %s3790_s20 = scalar_select %p47_p13, %s3503_s26, %s49_s4  }
  0x86   : > { %s3053_s19 = smul.u32 5, %s3515_s29  ;;  %s268_s16 = scalar_lea.vmem [#allocation2], %s3052_s15 }
  0x87   : > { %s3054_s24 = smul.u32 10, %s3519_s30  ;;  %s278_s1 = sshll.u32 %s268_s16, 4  ;;  %s3800_s1 = int_to_ptr.vmem [resolvable:$true] %s278_s1 }
  0x88   : > { %p3796_p3 = pnand %p3106_p9, %p3775_p0  ;;  %s4254_s0 = sld [smem:[#allocation24_spill]] }
  0x89   : > { %s274_s3 = sadd.s32 %s3054_s24, %s3053_s19  ;;  %s265_s28 = scalar_lea.sflag [#allocation3], %s264_s9 }
  0x8a   : > { %s2870_s5 = sshll.u32 %s274_s3, 6  ;;  %p3305_p1 = pneg %p3796_p3 }
  0x8e   : > { %s3805_s4 = scalar_lea.hbm %s4254_s0, %s2870_s5  ;;  %s3308_s19 = scalar_lea.hbm %s4254_s0, 1280 }
  0x8f   : > { %s3303_s13 = scalar_lea.hbm %s3805_s4, 320  ;;  %p3309_p12 = scmp.lt.u32.totalorder %s3805_s4, %s4254_s0 }
  0x90   : > { %p3304_p7 = scmp.ne.s32.totalorder %s3805_s4, %s3303_s13  ;;  %p3310_p5 = scmp.lt.u32.totalorder %s3308_s19, %s3303_s13 }
  0x91   : > { %p3312_p8 = scmp.lt.u32.totalorder %s3303_s13, %s3805_s4 }
  0x92   : > { %p3306_p2 = pnand %p3305_p1, %p3304_p7  ;;  %p3311_p6 = por %p3310_p5, %p3309_p12 }
  0x94   : > { %p3307_p4 = pneg %p3306_p2  ;;  %p3313_p0 = por %p3312_p8, %p3311_p6 }
  0x96   : > { %p3314_p9 = pnand %p3313_p0, %p3307_p4 }
  0x98   : > { %3317 = shalt.err (!%p3314_p9)
}
  0x99   : > { %s3318_s9 = scalar_lea.vmem %s3800_s1, 320  ;;  %s3530_s5 = smov [#allocation2]  }
  0x9a   : > { %p3319_p11 = scmp.ne.s32.totalorder %s3800_s1, %s3318_s9  ;;  %s3323_s11 = sshll.u32 %s3530_s5, 4  ;;  %s3324_s11 = int_to_ptr.vmem [resolvable:$false] %s3323_s11 }
  0x9b   : > { %s3325_s12 = scalar_lea.vmem %s3324_s11, 640  ;;  %p3326_p2 = scmp.lt.s32.totalorder %s3800_s1, %s3324_s11 }
  0x9c   : > { %p3321_p13 = pnand %p3319_p11, %p3305_p1  ;;  %p3327_p12 = scmp.lt.s32.totalorder %s3325_s12, %s3318_s9 }
  0x9e   : > { %p3322_p7 = pneg %p3321_p13  ;;  %p3328_p5 = por %p3327_p12, %p3326_p2 }
  0xa0   : > { %p3329_p6 = pnand %p3328_p5, %p3322_p7 }
  0xa2   : > { %3332 = shalt.err (!%p3329_p6)
}
  0xa3   : > { %3092 = dma.hbm_to_vmem [thread:$0]  (!%p3796_p3), %s3805_s4, 320, %s3800_s1, %s265_s28  }
  0xa4   : > { %p4255_p4 = scmp.ne.s32.totalorder %s4244_s14, 0 }
  0xa5   : > { %s3835_s13 = sand.u32 (!%p4255_p4), 1, %s3499_s25   ;;  %p4256_p1 = scmp.ne.s32.totalorder (!%p4255_p4), %s4237_s10, 0 }
  0xa6   : > { %287 = sbr.rel (%p4255_p4) target bundleno = 794 (0x31a), region = 36  ;;  %s290_s3 = scalar_lea.sflag (!%p4255_p4), [#allocation3], %s3835_s13 }
  0xa7   : > { %s3055_s15 = smul.u32 (!%p4255_p4), 20, %s3835_s13 }
  0xa9   : > { %s293_s19 = scalar_lea.vmem (!%p4255_p4), [#allocation2], %s3055_s15 }
  0xad   : > { %3462 = dma.done.wait (%p4256_p1), %s290_s3, 320  }
  0xae   : > { %3464 = vsyncadd (%p4256_p1), %s290_s3, 4294966976  ;;  %p4257_p8 = scmp.eq.s32.totalorder %s3635_s8, 0 }
  0xb0   : > { %3466 = dma.done.wait (%p4257_p8), [#allocation6], 1280   ;;  %p4258_p3 = pmov %p4257_p8 }
  0xb2   : > { %3468 = vsyncadd (%p4258_p3), [#allocation6], 4294966016  ;;  %p4259_p0 = pmov %p4258_p3 }
  0xb4   : > { %3470 = dma.done.wait (%p4259_p0), [#allocation9], 80   ;;  %p4260_p9 = pmov %p4259_p0 }
  0xb5   : > { %v3531_v0 = vmov 0.0   ;;  %s334_s1 = sand.u32 1, %s3487_s22   ;;  %v3856_v1 = vld [vmem:[%s293_s19 + $0x8] sm:$0xff]  ;;  %v3858_v2 = vld [vmem:[%s293_s19] sm:$0xff]  ;;  %s3532_s10 = smov 127   ;;  %v3539_v6 = vmov 0  }
  0xb6   : > { %3472 = vsyncadd (%p4260_p9), [#allocation9], 4294967216  ;;  %520 = vmatprep.mubr.f32.mxu1 %v3531_v0  ;;  %449 = vmatprep.mubr.f32.mxu0 %v3531_v0  ;;  %s3854_s2 = sshll.u32 %s334_s1, 3  ;;  %v3864_v3 = vcombine.high %v3856_v1, %v3856_v1  ;;  %v3866_v4 = vld [vmem:[%s293_s19 + $0x10] sm:$0xf]  ;;  %v3872_v5 = vcombine.high %v3858_v2, %v3858_v2  ;;  %s3533_s14 = smov 126  }
  0xb7   : > { %359 = vrot.lane.b32.xlu0 %v3856_v1, %s3532_s10  ;;  %355 = vrot.lane.b32.xlu1 %v3858_v2, %s3532_s10  ;;  %s3534_s4 = smov 94   ;;  %s3535_s28 = smov 93   ;;  %v2551_v7 = vld [vmem:[#allocation7] sm:$0xff]  ;;  %vm365_vm0 = vcmask 1039360   ;;  %vm374_vm1 = vcmask 1043456   ;;  %vm370_vm2 = vcmask 31744  }
  0xb8   : > { %s3536_s24 = smov 92   ;;  %s3537_s16 = smov 60   ;;  %3216 = vset.pattern.permute.xlu0 %v3539_v6  ;;  %v349_v14 = vld [vmem:[#allocation5 + $0x8] sm:$0xff]  ;;  %vm3541_vm3 = vmmov 0   ;;  %v347_v21 = vld [vmem:[#allocation5] sm:$0xff]  ;;  %vm834_vm4 = vcmask 1031168  }
  0xb9   : > { %s3538_s9 = smov 59   ;;  %s3540_s5 = smov 58   ;;  %v823_v30 = vld [vmem:[#allocation5 + $0x10] sm:$0xff]  ;;  %vm1081_vm5 = vcmask 769024   ;;  %v1070_v37 = vld [vmem:[#allocation5 + $0x18] sm:$0xff]  ;;  %vm1328_vm6 = vcmask 760832  }
  0xba   : > { %v1317_v48 = vld [vmem:[#allocation5 + $0x20] sm:$0xff]  ;;  %vm1575_vm7 = vcmask 752640   ;;  %v1564_v58 = vld [vmem:[#allocation5 + $0x28] sm:$0xff]  ;;  %vm1822_vm8 = vcmask 490496   ;;  %vm2069_vm9 = vcmask 482304   ;;  %vm2316_vm10 = vcmask 474112  }
  0xbb   : > { %363 = vrot.lane.b32.xlu0 %v3866_v4, %s3532_s10  ;;  %361 = vrot.lane.b32.xlu1 %v3864_v3, %s3532_s10  ;;  %s3056_s11 = smul.u32 40, %s3835_s13  ;;  %vm2566_vm11 = vcmask 261120   ;;  %s4060_s15 = scalar_lea.vmem [#allocation11], %s3854_s2 }
  0xbc   : > { %s4063_s3 = scalar_lea.vmem [#allocation13], %s3854_s2  ;;  %p2949_p11 = scmp.ne.s32.totalorder %s3507_s27, 0 }
  0xbd   : > { %s4051_s12 = scalar_lea.vmem [#allocation10], %s3056_s11  ;;  %vm2572_vm12 = vcmask (!%p2949_p11), 7168  }
  0xbf   : > { %826 = vrot.lane.b32.xlu1 %v3872_v5, %s3533_s14  ;;  %357 = vrot.lane.b32.xlu0 %v3872_v5, %s3532_s10 }
  0xc3   : > { %824 = vrot.lane.b32.xlu1 %v3858_v2, %s3533_s14  ;;  %828 = vrot.lane.b32.xlu0 %v3856_v1, %s3533_s14 }
  0xc7   : > { %832 = vrot.lane.b32.xlu1 %v3866_v4, %s3533_s14  ;;  %830 = vrot.lane.b32.xlu0 %v3864_v3, %s3533_s14 }
  0xcb   : > { %1075 = vrot.lane.b32.xlu1 %v3856_v1, %s3534_s4  ;;  %1073 = vrot.lane.b32.xlu0 %v3872_v5, %s3534_s4 }
  0xcf   : > { %1077 = vrot.lane.b32.xlu1 %v3864_v3, %s3534_s4  ;;  %1071 = vrot.lane.b32.xlu0 %v3858_v2, %s3534_s4 }
  0xd3   : > { %1320 = vrot.lane.b32.xlu1 %v3872_v5, %s3535_s28  ;;  %1079 = vrot.lane.b32.xlu0 %v3866_v4, %s3534_s4 }
  0xd7   : > { %1318 = vrot.lane.b32.xlu1 %v3858_v2, %s3535_s28  ;;  %1322 = vrot.lane.b32.xlu0 %v3856_v1, %s3535_s28 }
  0xdb   : > { %1326 = vrot.lane.b32.xlu1 %v3866_v4, %s3535_s28  ;;  %1324 = vrot.lane.b32.xlu0 %v3864_v3, %s3535_s28 }
  0xdf   : > { %1569 = vrot.lane.b32.xlu1 %v3856_v1, %s3536_s24  ;;  %1567 = vrot.lane.b32.xlu0 %v3872_v5, %s3536_s24 }
  0xe3   : > { %1571 = vrot.lane.b32.xlu1 %v3864_v3, %s3536_s24  ;;  %1565 = vrot.lane.b32.xlu0 %v3858_v2, %s3536_s24 }
  0xe7   : > { %1814 = vrot.lane.b32.xlu1 %v3872_v5, %s3537_s16  ;;  %1573 = vrot.lane.b32.xlu0 %v3866_v4, %s3536_s24 }
  0xeb   : > { %1812 = vrot.lane.b32.xlu1 %v3858_v2, %s3537_s16  ;;  %1816 = vrot.lane.b32.xlu0 %v3856_v1, %s3537_s16 }
  0xef   : > { %1820 = vrot.lane.b32.xlu1 %v3866_v4, %s3537_s16  ;;  %1818 = vrot.lane.b32.xlu0 %v3864_v3, %s3537_s16 }
  0xf3   : > { %2063 = vrot.lane.b32.xlu1 %v3856_v1, %s3538_s9  ;;  %2061 = vrot.lane.b32.xlu0 %v3872_v5, %s3538_s9 }
  0xf7   : > { %2065 = vrot.lane.b32.xlu1 %v3864_v3, %s3538_s9  ;;  %2059 = vrot.lane.b32.xlu0 %v3858_v2, %s3538_s9 }
  0xfb   : > { %2308 = vrot.lane.b32.xlu1 %v3872_v5, %s3540_s5  ;;  %2067 = vrot.lane.b32.xlu0 %v3866_v4, %s3538_s9 }
  0xff   : > { %2306 = vrot.lane.b32.xlu1 %v3858_v2, %s3540_s5  ;;  %2310 = vrot.lane.b32.xlu0 %v3856_v1, %s3540_s5 }
 0x103   : > { %2314 = vrot.lane.b32.xlu1 %v3866_v4, %s3540_s5  ;;  %2312 = vrot.lane.b32.xlu0 %v3864_v3, %s3540_s5 }
 0x107   : > { %2554 = vperm.xlu0 %3216, %v2551_v7  }
 0x129   : > { %v360_v8 = vpop.permute.xlu0 %359  ;;  %v356_v9 = vpop.permute.xlu1 %355 }
 0x12d   : > { %v364_v10 = vpop.permute.xlu0 %363  ;;  %v362_v11 = vpop.permute.xlu1 %361 }
 0x12e   : > { %v369_v12 = vsel %vm365_vm0, %v362_v11, %v364_v10  ;;  %v368_v13 = vsel %vm365_vm0, %v360_v8, %v362_v11 }
 0x12f   : > { %2880 = vmatprep.subr.msk.mxu1 %vm374_vm1, %v369_v12  ;;  %v2058_v12 = vld [vmem:[#allocation5 + $0x38] sm:$0xff] }
 0x130   : > { %2881 = vmatpush1.msk.msra.mxu1 %vm374_vm1, %v368_v13 }
 0x131   : > { %2882 = vmatmul.mubr.msk.f32.vlgmr.msra.gmra.mrb[0].mxu1 %vm370_vm2, %v349_v14  ;;  %v827_v15 = vpop.permute.xlu1 %826  ;;  %v358_v16 = vpop.permute.xlu0 %357  ;;  %2888 = vmatprep.subr.msk.mxu1 %vm374_vm1, %v3864_v3 }
 0x132   : > { %v367_v17 = vsel %vm365_vm0, %v358_v16, %v360_v8  ;;  %v366_v18 = vsel %vm365_vm0, %v356_v9, %v358_v16  ;;  %2889 = vmatpush1.msk.msra.mxu1 %vm374_vm1, %v3856_v1  ;;  %745 = vmatprep.mubr.f32.mxu1 %v3531_v0 }
 0x133   : > { %2877 = vmatprep.subr.msk.mxu0 %vm374_vm1, %v367_v17  ;;  %2980 = vmatprep.subr.mxu1 %v3531_v0 }
 0x134   : > { %2878 = vmatpush1.msk.msra.mxu0 %vm374_vm1, %v366_v18 }
 0x135   : > { %v825_v19 = vpop.permute.xlu1 %824  ;;  %2879 = vmatmul.mubr.msk.f32.vlgmr.msra.gmra.mrb[0].mxu0 %vm370_vm2, %v349_v14  ;;  %2975 = vmatprep.subr.mxu0 %v3531_v0  ;;  %v829_v20 = vpop.permute.xlu0 %828 }
 0x136   : > { %2976 = vmatpush3.msk.msra.mxu0 %vm374_vm1, %v364_v10  ;;  %2977 = vmatprep.mubr.msk.f32.mxu0 %vm3541_vm3, %v3531_v0  ;;  %v836_v24 = vsel %vm834_vm4, %v827_v15, %v829_v20  ;;  %v835_v26 = vsel %vm834_vm4, %v825_v19, %v827_v15 }
 0x137   : > { %2885 = vmatprep.subr.msk.mxu0 %vm374_vm1, %v3872_v5  ;;  %v1811_v5 = vld [vmem:[#allocation5 + $0x30] sm:$0xff] }
 0x139   : > { %2890 = vmatmul.mubr.msk.f32.vlgmr.msra.gmra.mrb[0].mxu1 %vm370_vm2, %v347_v21  ;;  %v833_v22 = vpop.permute.xlu1 %832  ;;  %2978 = vmatmul.mubr.msk.f32.vlgmr.msra.gmra.mrb[2].mxu0 %vm370_vm2, %v349_v14  ;;  %v831_v23 = vpop.permute.xlu0 %830 }
 0x13a   : > { %2886 = vmatpush1.msk.msra.mxu0 %vm374_vm1, %v3858_v2  ;;  %v838_v25 = vsel %vm834_vm4, %v831_v23, %v833_v22  ;;  %2981 = vmatpush3.msk.msra.mxu1 %vm374_vm1, %v3866_v4  ;;  %v837_v27 = vsel %vm834_vm4, %v829_v20, %v831_v23 }
 0x13b   : > { %2893 = vmatprep.subr.msk.mxu0 %vm374_vm1, %v836_v24  ;;  %2896 = vmatprep.subr.msk.mxu1 %vm374_vm1, %v838_v25 }
 0x13c   : > { %674 = vmatprep.mubr.f32.mxu0 %v3531_v0  ;;  %2982 = vmatprep.mubr.msk.f32.mxu1 %vm3541_vm3, %v3531_v0 }
 0x13d   : > { %2983 = vmatmul.mubr.msk.f32.vlgmr.msra.gmra.mrb[2].mxu1 %vm370_vm2, %v347_v21  ;;  %v1076_v28 = vpop.permute.xlu1 %1075  ;;  %2887 = vmatmul.mubr.msk.f32.vlgmr.msra.gmra.mrb[0].mxu0 %vm370_vm2, %v347_v21  ;;  %v1074_v29 = vpop.permute.xlu0 %1073  ;;  %v2305_v21 = vld [vmem:[#allocation5 + $0x40] sm:$0xff] }
 0x13e   : > { %2894 = vmatpush1.msk.msra.mxu0 %vm374_vm1, %v835_v26  ;;  %2897 = vmatpush1.msk.msra.mxu1 %vm374_vm1, %v837_v27  ;;  %v1083_v35 = vsel %vm1081_vm5, %v1074_v29, %v1076_v28 }
 0x13f   : > { %987 = vmatprep.mubr.f32.mxu1 %v3531_v0  ;;  %916 = vmatprep.mubr.f32.mxu0 %v3531_v0 }
 0x140   : > { %2985 = vmatprep.subr.mxu0 %v3531_v0 }
 0x141   : > { %v1078_v31 = vpop.permute.xlu1 %1077  ;;  %2898 = vmatmul.mubr.msk.f32.vlgmr.msra.gmra.mrb[0].mxu1 %vm370_vm2, %v823_v30  ;;  %v1072_v32 = vpop.permute.xlu0 %1071 }
 0x142   : > { %1234 = vmatprep.mubr.f32.mxu1 %v3531_v0  ;;  %v1084_v38 = vsel %vm1081_vm5, %v1076_v28, %v1078_v31  ;;  %v1082_v39 = vsel %vm1081_vm5, %v1072_v32, %v1074_v29 }
 0x145   : > { %v1321_v33 = vpop.permute.xlu1 %1320  ;;  %2895 = vmatmul.mubr.msk.f32.vlgmr.msra.gmra.mrb[0].mxu0 %vm370_vm2, %v823_v30  ;;  %v1080_v34 = vpop.permute.xlu0 %1079 }
 0x146   : > { %2986 = vmatpush3.msk.msra.mxu0 %vm374_vm1, %v833_v22  ;;  %v1085_v36 = vsel %vm1081_vm5, %v1078_v31, %v1080_v34  ;;  %2987 = vmatprep.mubr.msk.f32.mxu0 %vm3541_vm3, %v3531_v0 }
 0x147   : > { %2901 = vmatprep.subr.msk.mxu0 %vm374_vm1, %v1083_v35  ;;  %2904 = vmatprep.subr.msk.mxu1 %vm374_vm1, %v1085_v36 }
 0x148   : > { %2905 = vmatpush1.msk.msra.mxu1 %vm374_vm1, %v1084_v38 }
 0x149   : > { %v1319_v40 = vpop.permute.xlu1 %1318  ;;  %2988 = vmatmul.mubr.msk.f32.vlgmr.msra.gmra.mrb[4].mxu0 %vm370_vm2, %v823_v30  ;;  %2906 = vmatmul.mubr.msk.f32.vlgmr.msra.gmra.mrb[0].mxu1 %vm370_vm2, %v1070_v37  ;;  %v1323_v41 = vpop.permute.xlu0 %1322 }
 0x14a   : > { %2902 = vmatpush1.msk.msra.mxu0 %vm374_vm1, %v1082_v39  ;;  %2990 = vmatprep.subr.mxu1 %v3531_v0  ;;  %v1330_v42 = vsel %vm1328_vm6, %v1321_v33, %v1323_v41  ;;  %v1329_v43 = vsel %vm1328_vm6, %v1319_v40, %v1321_v33 }
 0x14b   : > { %2991 = vmatpush3.msk.msra.mxu1 %vm374_vm1, %v1080_v34  ;;  %2909 = vmatprep.subr.msk.mxu0 %vm374_vm1, %v1330_v42 }
 0x14c   : > { %1163 = vmatprep.mubr.f32.mxu0 %v3531_v0  ;;  %2992 = vmatprep.mubr.msk.f32.mxu1 %vm3541_vm3, %v3531_v0 }
 0x14d   : > { %v1327_v44 = vpop.permute.xlu1 %1326  ;;  %2903 = vmatmul.mubr.msk.f32.vlgmr.msra.gmra.mrb[0].mxu0 %vm370_vm2, %v1070_v37  ;;  %2993 = vmatmul.mubr.msk.f32.vlgmr.msra.gmra.mrb[4].mxu1 %vm370_vm2, %v1070_v37  ;;  %v1325_v45 = vpop.permute.xlu0 %1324 }
 0x14e   : > { %2910 = vmatpush1.msk.msra.mxu0 %vm374_vm1, %v1329_v43  ;;  %v1331_v46 = vsel %vm1328_vm6, %v1323_v41, %v1325_v45  ;;  %v1332_v47 = vsel %vm1328_vm6, %v1325_v45, %v1327_v44  ;;  %1410 = vmatprep.mubr.f32.mxu0 %v3531_v0 }
 0x14f   : > { %2912 = vmatprep.subr.msk.mxu1 %vm374_vm1, %v1332_v47  ;;  %1481 = vmatprep.mubr.f32.mxu1 %v3531_v0 }
 0x150   : > { %2913 = vmatpush1.msk.msra.mxu1 %vm374_vm1, %v1331_v46  ;;  %2995 = vmatprep.subr.mxu0 %v3531_v0 }
 0x151   : > { %v1570_v49 = vpop.permute.xlu1 %1569  ;;  %v1568_v50 = vpop.permute.xlu0 %1567  ;;  %2914 = vmatmul.mubr.msk.f32.vlgmr.msra.gmra.mrb[0].mxu1 %vm370_vm2, %v1317_v48 }
 0x152   : > { %1728 = vmatprep.mubr.f32.mxu1 %v3531_v0  ;;  %v1577_v53 = vsel %vm1575_vm7, %v1568_v50, %v1570_v49 }
 0x155   : > { %v1572_v51 = vpop.permute.xlu1 %1571  ;;  %2911 = vmatmul.mubr.msk.f32.vlgmr.msra.gmra.mrb[0].mxu0 %vm370_vm2, %v1317_v48  ;;  %v1566_v52 = vpop.permute.xlu0 %1565 }
 0x156   : > { %2996 = vmatpush3.msk.msra.mxu0 %vm374_vm1, %v1327_v44  ;;  %2997 = vmatprep.mubr.msk.f32.mxu0 %vm3541_vm3, %v3531_v0  ;;  %v1576_v54 = vsel %vm1575_vm7, %v1566_v52, %v1568_v50  ;;  %v1578_v59 = vsel %vm1575_vm7, %v1570_v49, %v1572_v51 }
 0x157   : > { %2917 = vmatprep.subr.msk.mxu0 %vm374_vm1, %v1577_v53 }
 0x159   : > { %v1815_v55 = vpop.permute.xlu1 %1814  ;;  %2998 = vmatmul.mubr.msk.f32.vlgmr.msra.gmra.mrb[6].mxu0 %vm370_vm2, %v1317_v48  ;;  %v1574_v56 = vpop.permute.xlu0 %1573 }
 0x15a   : > { %2918 = vmatpush1.msk.msra.mxu0 %vm374_vm1, %v1576_v54  ;;  %v1579_v57 = vsel %vm1575_vm7, %v1572_v51, %v1574_v56  ;;  %1657 = vmatprep.mubr.f32.mxu0 %v3531_v0 }
 0x15b   : > { %2920 = vmatprep.subr.msk.mxu1 %vm374_vm1, %v1579_v57 }
 0x15c   : > { %2921 = vmatpush1.msk.msra.mxu1 %vm374_vm1, %v1578_v59 }
 0x15d   : > { %v1813_v60 = vpop.permute.xlu1 %1812  ;;  %2919 = vmatmul.mubr.msk.f32.vlgmr.msra.gmra.mrb[0].mxu0 %vm370_vm2, %v1564_v58  ;;  %2922 = vmatmul.mubr.msk.f32.vlgmr.msra.gmra.mrb[0].mxu1 %vm370_vm2, %v1564_v58  ;;  %v1817_v61 = vpop.permute.xlu0 %1816 }
 0x15e   : > { %v1823_v62 = vsel %vm1822_vm8, %v1813_v60, %v1815_v55  ;;  %3000 = vmatprep.subr.mxu1 %v3531_v0  ;;  %v1824_v63 = vsel %vm1822_vm8, %v1815_v55, %v1817_v61  ;;  %3002 = vmatprep.mubr.msk.f32.mxu1 %vm3541_vm3, %v3531_v0 }
 0x15f   : > { %3001 = vmatpush3.msk.msra.mxu1 %vm374_vm1, %v1574_v56  ;;  %2925 = vmatprep.subr.msk.mxu0 %vm374_vm1, %v1824_v63 }
 0x160   : > { %2926 = vmatpush1.msk.msra.mxu0 %vm374_vm1, %v1823_v62  ;;  %1904 = vmatprep.mubr.f32.mxu0 %v3531_v0 }
 0x161   : > { %v1821_v1 = vpop.permute.xlu1 %1820  ;;  %3003 = vmatmul.mubr.msk.f32.vlgmr.msra.gmra.mrb[6].mxu1 %vm370_vm2, %v1564_v58  ;;  %v1819_v2 = vpop.permute.xlu0 %1818  ;;  %3005 = vmatprep.subr.mxu0 %v3531_v0 }
 0x162   : > { %v1825_v3 = vsel %vm1822_vm8, %v1817_v61, %v1819_v2  ;;  %v1826_v4 = vsel %vm1822_vm8, %v1819_v2, %v1821_v1  ;;  %1975 = vmatprep.mubr.f32.mxu1 %v3531_v0  ;;  %v3542_v61 = vmov (!%p2949_p11), 0.0  }
 0x163   : > { %2928 = vmatprep.subr.msk.mxu1 %vm374_vm1, %v1826_v4  ;;  %2573 = vst.msk [vmem:[%s4060_s15] sm:$0xff] (!%p2949_p11), %vm2572_vm12, %v3542_v61  ;;  %2574 = vst.msk [vmem:[%s4063_s3] sm:$0xff] (!%p2949_p11), %vm2572_vm12, %v3542_v61 }
 0x164   : > { %2929 = vmatpush1.msk.msra.mxu1 %vm374_vm1, %v1825_v3 }
 0x165   : > { %v2064_v6 = vpop.permute.xlu1 %2063  ;;  %2927 = vmatmul.mubr.msk.f32.vlgmr.msra.gmra.mrb[0].mxu0 %vm370_vm2, %v1811_v5  ;;  %v2062_v7 = vpop.permute.xlu0 %2061  ;;  %2930 = vmatmul.mubr.msk.f32.vlgmr.msra.gmra.mrb[0].mxu1 %vm370_vm2, %v1811_v5 }
 0x166   : > { %3006 = vmatpush3.msk.msra.mxu0 %vm374_vm1, %v1821_v1  ;;  %v2071_v8 = vsel %vm2069_vm9, %v2062_v7, %v2064_v6  ;;  %3007 = vmatprep.mubr.msk.f32.mxu0 %vm3541_vm3, %v3531_v0 }
 0x167   : > { %2933 = vmatprep.subr.msk.mxu0 %vm374_vm1, %v2071_v8  ;;  %2222 = vmatprep.mubr.f32.mxu1 %v3531_v0 }
 0x169   : > { %v2066_v9 = vpop.permute.xlu1 %2065  ;;  %3008 = vmatmul.mubr.msk.f32.vlgmr.msra.gmra.mrb[8].mxu0 %vm370_vm2, %v1811_v5  ;;  %v2060_v10 = vpop.permute.xlu0 %2059 }
 0x16a   : > { %v2070_v11 = vsel %vm2069_vm9, %v2060_v10, %v2062_v7  ;;  %2151 = vmatprep.mubr.f32.mxu0 %v3531_v0  ;;  %v2072_v16 = vsel %vm2069_vm9, %v2064_v6, %v2066_v9 }
 0x16b   : > { %2934 = vmatpush1.msk.msra.mxu0 %vm374_vm1, %v2070_v11 }
 0x16d   : > { %v2309_v13 = vpop.permute.xlu1 %2308  ;;  %2935 = vmatmul.mubr.msk.f32.vlgmr.msra.gmra.mrb[0].mxu0 %vm370_vm2, %v2058_v12  ;;  %v2068_v14 = vpop.permute.xlu0 %2067 }
 0x16e   : > { %v2073_v15 = vsel %vm2069_vm9, %v2066_v9, %v2068_v14  ;;  %2398 = vmatprep.mubr.f32.mxu0 %v3531_v0 }
 0x16f   : > { %2936 = vmatprep.subr.msk.mxu1 %vm374_vm1, %v2073_v15 }
 0x170   : > { %2937 = vmatpush1.msk.msra.mxu1 %vm374_vm1, %v2072_v16 }
 0x171   : > { %v2307_v17 = vpop.permute.xlu1 %2306  ;;  %2938 = vmatmul.mubr.msk.f32.vlgmr.msra.gmra.mrb[0].mxu1 %vm370_vm2, %v2058_v12  ;;  %3010 = vmatprep.subr.mxu1 %v3531_v0  ;;  %v2311_v18 = vpop.permute.xlu0 %2310 }
 0x172   : > { %v2317_v19 = vsel %vm2316_vm10, %v2307_v17, %v2309_v13  ;;  %v2318_v20 = vsel %vm2316_vm10, %v2309_v13, %v2311_v18  ;;  %3011 = vmatpush3.msk.msra.mxu1 %vm374_vm1, %v2068_v14  ;;  %3012 = vmatprep.mubr.msk.f32.mxu1 %vm3541_vm3, %v3531_v0 }
 0x173   : > { %2941 = vmatprep.subr.msk.mxu0 %vm374_vm1, %v2318_v20 }
 0x174   : > { %2942 = vmatpush1.msk.msra.mxu0 %vm374_vm1, %v2317_v19 }
 0x175   : > { %v2315_v22 = vpop.permute.xlu1 %2314  ;;  %3013 = vmatmul.mubr.msk.f32.vlgmr.msra.gmra.mrb[8].mxu1 %vm370_vm2, %v2058_v12  ;;  %2943 = vmatmul.mubr.msk.f32.vlgmr.msra.gmra.mrb[0].mxu0 %vm370_vm2, %v2305_v21  ;;  %v2313_v23 = vpop.permute.xlu0 %2312 }
 0x176   : > { %v2319_v24 = vsel %vm2316_vm10, %v2311_v18, %v2313_v23  ;;  %v2320_v25 = vsel %vm2316_vm10, %v2313_v23, %v2315_v22  ;;  %3015 = vmatprep.subr.mxu0 %v3531_v0  ;;  %2469 = vmatprep.mubr.f32.mxu1 %v3531_v0 }
 0x177   : > { %2944 = vmatprep.subr.msk.mxu1 %vm374_vm1, %v2320_v25  ;;  %3016 = vmatpush3.msk.msra.mxu0 %vm374_vm1, %v2315_v22 }
 0x178   : > { %2945 = vmatpush1.msk.msra.mxu1 %vm374_vm1, %v2319_v24  ;;  %3017 = vmatprep.mubr.msk.f32.mxu0 %vm3541_vm3, %v3531_v0 }
 0x179   : > { %2946 = vmatmul.mubr.msk.f32.vlgmr.msra.gmra.mrb[0].mxu1 %vm370_vm2, %v2305_v21  ;;  %3018 = vmatmul.mubr.msk.f32.vlgmr.msra.gmra.mrb[10].mxu0 %vm370_vm2, %v2305_v21 }
 0x186   : > { %v2555_v45 = vpop.permute.xlu0 %2554 }
 0x20c   : > { %v593_v26 = vpop.f32.mrb[2].mxu0 }
 0x20d   : > { %v2979_v27 = vpop.f32.mrb[3].mxu0 }
 0x210   : > { %v818_v28 = vpop.f32.mrb[2].mxu1 }
 0x211   : > { %v819_v29 = vadd.f32 %v818_v28, %v593_v26  ;;  %v2984_v30 = vpop.f32.mrb[3].mxu1 }
 0x21c   : > { %v1060_v31 = vpop.f32.mrb[4].mxu0 }
 0x21d   : > { %v1068_v32 = vadd.f32 %v1060_v31, %v819_v29  ;;  %v2989_v33 = vpop.f32.mrb[5].mxu0 }
 0x220   : > { %v1307_v34 = vpop.f32.mrb[4].mxu1 }
 0x221   : > { %v1315_v35 = vadd.f32 %v1307_v34, %v1068_v32  ;;  %v2994_v36 = vpop.f32.mrb[5].mxu1 }
 0x22c   : > { %v1554_v37 = vpop.f32.mrb[6].mxu0 }
 0x22d   : > { %v1562_v38 = vadd.f32 %v1554_v37, %v1315_v35  ;;  %v2999_v39 = vpop.f32.mrb[7].mxu0 }
 0x234   : > { %v1801_v0 = vpop.f32.mrb[6].mxu1 }
 0x235   : > { %v1809_v40 = vadd.f32 %v1801_v0, %v1562_v38  ;;  %v3004_v41 = vpop.f32.mrb[7].mxu1 }
 0x23c   : > { %v2048_v42 = vpop.f32.mrb[8].mxu0 }
 0x23d   : > { %v2056_v43 = vadd.f32 %v2048_v42, %v1809_v40  ;;  %v3009_v44 = vpop.f32.mrb[9].mxu0 }
 0x248   : > { %v2295_v46 = vpop.f32.mrb[8].mxu1  ;;  %v2400_v47 = vpop.f32.mrb[0].mxu0 }
 0x249   : > { %v2303_v48 = vadd.f32 %v2295_v46, %v2056_v43  ;;  %v2557_v49 = vadd.f32 %v2555_v45, %v2400_v47  ;;  %v2402_v50 = vpop.f32.mrb[1].mxu0  ;;  %v3014_v51 = vpop.f32.mrb[9].mxu1 }
 0x24a   : > { %v2558_v52 = vadd.f32 %v2555_v45, %v2402_v50 }
 0x24b   : > { %2562 = vst [vmem:[%s4051_s12] sm:$0xff] %v2557_v49  ;;  %2571 = sbr.rel (%p2949_p11) target bundleno = 594 (0x252), region = 56 }
 0x24c   : > { %2563 = vst [vmem:[%s4051_s12 + $0x8] sm:$0xff] %v2558_v52  ;;  %v2471_v53 = vpop.f32.mrb[0].mxu1  ;;  %v2542_v54 = vpop.f32.mrb[10].mxu0 }
 0x24d   : > { %v2559_v55 = vadd.f32 %v2555_v45, %v2471_v53  ;;  %v2550_v56 = vadd.f32 %v2542_v54, %v2303_v48  ;;  %v2473_v57 = vpop.f32.mrb[1].mxu1  ;;  %v3019_v58 = vpop.f32.mrb[11].mxu0 }
 0x24e   : > { %v2560_v59 = vadd.f32 %v2555_v45, %v2473_v57 }
 0x24f   : > { %2564 = vst [vmem:[%s4051_s12 + $0x10] sm:$0xff] %v2559_v55  ;;  %v2561_v60 = vadd.f32 %v2555_v45, %v2550_v56 }
 0x250   : > { %2565 = vst [vmem:[%s4051_s12 + $0x18] sm:$0xff] %v2560_v59 }
 0x251   : > { %2567 = vst.msk [vmem:[%s4051_s12 + $0x20] sm:$0xff] %vm2566_vm11, %v2561_v60 }
 0x252 PF: > { %v2577_v62 = vlaneseq  ;;  %v2575_v1 = vld [vmem:[#allocation8] sm:$0x1f]  ;;  %s4261_s19 = sld [smem:[#allocation20_spill]]  ;;  %s3057_s1 = smul.u32 5, %s3507_s27 }
 0x253   : > { %s2660_s14 = sshll.u32 %s4051_s12, 4  ;;  %s4262_s16 = sld [smem:[#allocation28_spill]]  ;;  %s4073_s14 = int_to_ptr.vmem [resolvable:$true] %s2660_s14 }
 0x254   : > { %v2578_v63 = vshrl.u32 %v2577_v62, 7  ;;  %s2634_s5 = scalar_lea.sflag [#allocation4], %s3835_s13  ;;  %s3333_s11 = scalar_lea.vmem %s4073_s14, 640 }
 0x255   : > { %p3334_p13 = scmp.ne.s32.totalorder %s4073_s14, %s3333_s11  ;;  %s3543_s27 = smov [#allocation10]  }
 0x256   : > { %v2579_v2 = vsub.s32 0, %v2578_v63  ;;  %v2583_v3 = vsub.s32 1, %v2578_v63  ;;  %v2587_v4 = vsub.s32 2, %v2578_v63  ;;  %v2591_v5 = vsub.s32 3, %v2578_v63  ;;  %s3337_s0 = sshll.u32 %s3543_s27, 4  ;;  %s3338_s0 = int_to_ptr.vmem [resolvable:$false] %s3337_s0 }
 0x257   : > { %v2595_v6 = vsub.s32 4, %v2578_v63  ;;  %p3335_p7 = pnand %p3334_p13, %p3769_p10  ;;  %s3339_s12 = scalar_lea.vmem %s3338_s0, 1280 }
 0x258   : > { %v2580_v7 = vrot.slane %v2575_v1, %v2579_v2  ;;  %v2584_v8 = vrot.slane %v2575_v1, %v2583_v3  ;;  %v2588_v9 = vrot.slane %v2575_v1, %v2587_v4  ;;  %v2592_v10 = vrot.slane %v2575_v1, %v2591_v5  ;;  %s3058_s2 = smul.u32 10, %s4261_s19  ;;  %p3340_p12 = scmp.lt.s32.totalorder %s4073_s14, %s3338_s0 }
 0x259   : > { %v2596_v11 = vrot.slane %v2575_v1, %v2595_v6  ;;  %p3336_p2 = pneg %p3335_p7  ;;  %p3341_p5 = scmp.lt.s32.totalorder %s3339_s12, %s3333_s11 }
 0x25a   : > { %v2602_v12 = vmul.f32 %v2580_v7, %v2557_v49  ;;  %v2603_v13 = vmul.f32 %v2584_v8, %v2558_v52  ;;  %v2604_v14 = vmul.f32 %v2588_v9, %v2559_v55  ;;  %v2605_v15 = vmul.f32 %v2592_v10, %v2560_v59  ;;  %s2656_s10 = sadd.s32 %s3058_s2, %s3057_s1 }
 0x25b   : > { %v2606_v16 = vmul.f32 %v2596_v11, %v2561_v60  ;;  %s2952_s4 = sshll.u32 %s2656_s10, 7  ;;  %p3342_p6 = por %p3341_p5, %p3340_p12 }
 0x25c   : > { %v2608_v17 = vadd.f32 %v2603_v13, %v2602_v12  ;;  %v2619_v18 = vmul.f32 %v2602_v12, %v2557_v49  ;;  %v2620_v19 = vmul.f32 %v2603_v13, %v2558_v52  ;;  %v2621_v20 = vmul.f32 %v2604_v14, %v2559_v55  ;;  %s2658_s9 = scalar_lea.hbm %s4262_s16, %s2952_s4 }
 0x25d   : > { %v2623_v21 = vmul.f32 %v2606_v16, %v2561_v60  ;;  %v2622_v23 = vmul.f32 %v2605_v15, %v2560_v59  ;;  %v2611_v25 = vsel %vm2566_vm11, %v2606_v16, 0.0  ;;  %p3343_p4 = pnand %p3342_p6, %p3336_p2 }
 0x25e   : > { %v2609_v22 = vadd.f32 %v2608_v17, %v2604_v14  ;;  %v2624_v24 = vadd.f32 %v2620_v19, %v2619_v18 }
 0x25f   : > { %v2627_v28 = vsel %vm2566_vm11, %v2623_v21, 0.0 }
 0x260   : > { %v2610_v26 = vadd.f32 %v2609_v22, %v2605_v15  ;;  %v2625_v27 = vadd.f32 %v2624_v24, %v2621_v20 }
 0x262   : > { %v2612_v29 = vadd.f32 %v2611_v25, %v2610_v26  ;;  %v2626_v30 = vadd.f32 %v2625_v27, %v2622_v23 }
 0x264   : > { %2613 = vadd.xlane.f32.xlu0 %v2612_v29  ;;  %v2628_v31 = vadd.f32 %v2627_v28, %v2626_v30 }
 0x268   : > { %2629 = vadd.xlane.f32.xlu0 %v2628_v31 }
 0x269   : > { %3346 = shalt.err (!%p3343_p4)
}
 0x26a   : > { %s3347_s1 = scalar_lea.hbm %s2658_s9, 640  ;;  %s3351_s10 = scalar_lea.hbm %s4262_s16, 2560 }
 0x26b   : > { %p3348_p1 = scmp.ne.s32.totalorder %s2658_s9, %s3347_s1  ;;  %p3352_p0 = scmp.lt.u32.totalorder %s2658_s9, %s4262_s16 }
 0x26c   : > { %p3353_p9 = scmp.lt.u32.totalorder %s3351_s10, %s3347_s1  ;;  %p3355_p13 = scmp.lt.u32.totalorder %s3347_s1, %s2658_s9 }
 0x26d   : > { %p3349_p8 = pnand %p3348_p1, %p3769_p10 }
 0x26e   : > { %p3354_p11 = por %p3353_p9, %p3352_p0 }
 0x26f   : > { %p3350_p3 = pneg %p3349_p8 }
 0x270   : > { %p3356_p7 = por %p3355_p13, %p3354_p11 }
 0x272   : > { %p3357_p2 = pnand %p3356_p7, %p3350_p3 }
 0x274   : > { %3360 = shalt.err (!%p3357_p2)
}
 0x275   : > { %3073 = dma.vmem_to_hbm [thread:$0]  (%p3769_p10), %s4073_s14, 640, %s2658_s9, %s2634_s5   ;;  %v2607_v32 = vld [vmem:[%s4060_s15] sm:$0xff]  ;;  %vm2616_vm13 = vcmask 7168   ;;  %v2618_v35 = vld [vmem:[%s4063_s3] sm:$0xff] }
 0x276   : > { %s2638_s0 = sand.u32 1, %s3635_s8   ;;  %s4263_s24 = sld [smem:[#allocation22_spill]] }
 0x277   : > { %s2953_s11 = sshll.u32 %s4261_s19, 7  ;;  %s2673_s27 = sshll.u32 %s4060_s15, 4  ;;  %s4106_s27 = int_to_ptr.vmem [resolvable:$true] %s2673_s27 }
 0x278   : > { %s4264_s1 = sld [smem:[#allocation29_spill]]  ;;  %s2686_s8 = sshll.u32 %s4063_s3, 4  ;;  %s2687_s8 = int_to_ptr.vmem [resolvable:$true] %s2686_s8 }
 0x279   : > { %s4112_s14 = scalar_lea.sflag [#allocation12], %s2638_s0  ;;  %s3361_s9 = scalar_lea.vmem %s4106_s27, 128 }
 0x27a   : > { %p3362_p10 = scmp.ne.s32.totalorder %s4106_s27, %s3361_s9  ;;  %s3544_s5 = smov [#allocation11]  }
 0x27b   : > { %s3365_s2 = sshll.u32 %s3544_s5, 4  ;;  %s3366_s2 = int_to_ptr.vmem [resolvable:$false] %s3365_s2 }
 0x27c   : > { %p4265_p12 = scmp.ne.s32.totalorder %s4263_s24, 0  ;;  %s3367_s10 = scalar_lea.vmem %s3366_s2, 256 }
 0x27d   : > { %p3368_p4 = scmp.lt.s32.totalorder %s4106_s27, %s3366_s2  ;;  %p3369_p1 = scmp.lt.s32.totalorder %s3367_s10, %s3361_s9 }
 0x27e   : > { %s4104_s13 = scalar_lea.hbm %s4264_s1, %s2953_s11  ;;  %p3363_p5 = pnand %p3362_p10, %p4265_p12 }
 0x27f   : > { %p3370_p8 = por %p3369_p1, %p3368_p4 }
 0x280   : > { %p3364_p6 = pneg %p3363_p5 }
 0x282   : > { %p3371_p3 = pnand %p3370_p8, %p3364_p6 }
 0x2f1   : > { %v2614_v33 = vpop.xlane.xlu0 %2613 }
 0x2f2   : > { %v2615_v34 = vadd.f32 %v2614_v33, %v2607_v32 }
 0x2f4   : > { %2617 = vst.msk [vmem:[%s4060_s15] sm:$0xff] %vm2616_vm13, %v2615_v34 }
 0x2f5   : > { %v2630_v36 = vpop.xlane.xlu0 %2629 }
 0x2f6   : > { %3374 = shalt.err (!%p3371_p3)
}
 0x2f7   : > { %s3375_s15 = scalar_lea.hbm %s4104_s13, 128  ;;  %s3379_s0 = scalar_lea.hbm %s4264_s1, 256 }
 0x2f8   : > { %p3376_p0 = scmp.ne.s32.totalorder %s4104_s13, %s3375_s15  ;;  %p3380_p13 = scmp.lt.u32.totalorder %s4104_s13, %s4264_s1 }
 0x2f9   : > { %p3381_p7 = scmp.lt.u32.totalorder %s3379_s0, %s3375_s15  ;;  %p3383_p10 = scmp.lt.u32.totalorder %s3375_s15, %s4104_s13 }
 0x2fa   : > { %p3377_p9 = pnand %p3376_p0, %p4265_p12 }
 0x2fb   : > { %p3382_p2 = por %p3381_p7, %p3380_p13 }
 0x2fc   : > { %p3378_p11 = pneg %p3377_p9 }
 0x2fd   : > { %p3384_p5 = por %p3383_p10, %p3382_p2 }
 0x2ff   : > { %p3385_p6 = pnand %p3384_p5, %p3378_p11 }
 0x301   : > { %3388 = shalt.err (!%p3385_p6)
}
 0x302   : > { %3074 = dma.vmem_to_hbm [thread:$0]  (%p4265_p12), %s4106_s27, 128, %s4104_s13, %s4112_s14   ;;  %v2631_v37 = vadd.f32 %v2630_v36, %v2618_v35 }
 0x303   : > { %s4266_s2 = sld [smem:[#allocation30_spill]]  ;;  %s3389_s15 = scalar_lea.vmem %s2687_s8, 128 }
 0x304   : > { %2632 = vst.msk [vmem:[%s4063_s3] sm:$0xff] %vm2616_vm13, %v2631_v37  ;;  %p3390_p4 = scmp.ne.s32.totalorder %s2687_s8, %s3389_s15  ;;  %s3545_s4 = smov [#allocation13]  }
 0x305   : > { %s3393_s28 = sshll.u32 %s3545_s4, 4  ;;  %s3394_s28 = int_to_ptr.vmem [resolvable:$false] %s3393_s28 }
 0x306   : > { %p3391_p1 = pnand %p3390_p4, %p4265_p12  ;;  %s3395_s27 = scalar_lea.vmem %s3394_s28, 256 }
 0x307   : > { %p3396_p3 = scmp.lt.s32.totalorder %s2687_s8, %s3394_s28  ;;  %p3397_p0 = scmp.lt.s32.totalorder %s3395_s27, %s3389_s15 }
 0x308   : > { %p3392_p8 = pneg %p3391_p1 }
 0x309   : > { %s4141_s10 = scalar_lea.hbm %s4266_s2, %s2953_s11  ;;  %p3398_p9 = por %p3397_p0, %p3396_p3 }
 0x30b   : > { %p3399_p11 = pnand %p3398_p9, %p3392_p8 }
 0x30d   : > { %3402 = shalt.err (!%p3399_p11)
}
 0x30e   : > { %s3403_s3 = scalar_lea.hbm %s4141_s10, 128  ;;  %s3407_s13 = scalar_lea.hbm %s4266_s2, 256 }
 0x30f   : > { %p3404_p13 = scmp.ne.s32.totalorder %s4141_s10, %s3403_s3  ;;  %p3408_p10 = scmp.lt.u32.totalorder %s4141_s10, %s4266_s2 }
 0x310   : > { %p3409_p5 = scmp.lt.u32.totalorder %s3407_s13, %s3403_s3  ;;  %p3411_p4 = scmp.lt.u32.totalorder %s3403_s3, %s4141_s10 }
 0x311   : > { %p3405_p7 = pnand %p3404_p13, %p4265_p12 }
 0x312   : > { %p3410_p6 = por %p3409_p5, %p3408_p10 }
 0x313   : > { %p3406_p2 = pneg %p3405_p7 }
 0x314   : > { %p3412_p1 = por %p3411_p4, %p3410_p6 }
 0x316   : > { %p3413_p8 = pnand %p3412_p1, %p3406_p2 }
 0x318   : > { %3416 = shalt.err (!%p3413_p8)
}
 0x319   : > { %3075 = dma.vmem_to_hbm [thread:$0]  (%p4265_p12), %s2687_s8, 128, %s4141_s10, %s4112_s14  }
 0x31a PF: > { %s4267_s12 = sld [smem:[#allocation19_spill]]  ;;  %s4268_s9 = sld [smem:[#allocation21_spill]] }
 0x31b   : > { %p3110_p3 = scmp.ge.s32.totalorder %s3523_s7, 2 }
 0x320   : > { %s2698_s5 = sand.u32 1, %s4267_s12   ;;  %p4269_p0 = scmp.ne.s32.totalorder %s4268_s9, 0 }
 0x321   : > { %s2699_s15 = scalar_lea.sflag [#allocation4], %s2698_s5 }
 0x322   : > { %p3094_p9 = pnand %p3110_p3, %p4269_p0 }
 0x324   : > { %3474 = dma.done.wait (!%p3094_p9), %s2699_s15, 640  }
 0x325   : > { %3476 = vsyncadd (!%p3094_p9), %s2699_s15, 4294966656  ;;  %s4270_s4 = sadd.s32 4294967294, %s3523_s7   ;;  %s4271_s28 = sld [smem:[#allocation23_spill]] }
 0x326   : > { %s2707_s27 = sand.u32 1, %s4270_s4  }
 0x327   : > { %s2708_s24 = scalar_lea.sflag [#allocation12], %s2707_s27 }
 0x32b   : > { %p4272_p11 = scmp.ne.s32.totalorder %s4271_s28, 0 }
 0x32d   : > { %p3097_p13 = pnand %p3110_p3, %p4272_p11 }
 0x32f   : > { %3478 = dma.done.wait (!%p3097_p13), %s2708_s24, 256  }
 0x330   : > { %3480 = vsyncadd (!%p3097_p13), %s2708_s24, 4294967040  ;;  %s28_s7 = sadd.s32 1, %s3523_s7   ;;  %s4273_s21 = smov %s3487_s22 }
 0x331   : > { %p25_p12 = scmp.ge.s32.totalorder %s28_s7, 6   ;;  %s4274_s22 = smov %s3491_s23 }
 0x332   : > { %s4275_s23 = smov %s3787_s18  ;;  %s4276_s24 = smov %s3499_s25 }
 0x333   : > { %s4277_s25 = smov %s3503_s26  ;;  %s4278_s26 = smov %s3790_s20 }
 0x334   : > { %s4279_s27 = smov %s3515_s29  ;;  %s4280_s28 = smov %s3519_s30 }
 0x335   : > { %s4281_s29 = smov %s4284_s6  ;;  %s4282_s30 = smov %s4288_s17 }
 0x336   :  { %27 = sbr.rel (!%p25_p12) target bundleno = 21 (0x15), region = 137 }
 0x33d   :  { %2722 = vsyncpa [#allocation3], 1 }
 0x33e   :  { %2724 = vsyncpa [#allocation3 + $0x1], 1 }
 0x33f   :  { %2725 = vsyncpa [#allocation6], 1 }
 0x340   :  { %2726 = vsyncpa [#allocation9], 1 }
 0x341   :  { %2727 = vsyncpa [#allocation4], 1 }
 0x342   :  { %2729 = vsyncpa [#allocation4 + $0x1], 1 }
 0x343   :  { %2730 = vsyncpa [#allocation12], 1 }
 0x344   :  { %2732 = vsyncpa [#allocation12 + $0x1], 1 }

</bundles_post_ra>
